<compile_context>
chip_gen: v6e
topology: v6e:2x2x1
jax: 0.10.0
libtpu: 0.0.40
codegen_flags: <defaults>
</compile_context>

<pallas_src>
import functools

import jax
import jax.numpy as jnp
from jax import lax
from jax.experimental import pallas as pl
from jax.experimental.pallas import tpu as pltpu


def _vq_kernel(z_ref, eaug_ref, zq_ref, idx_ref, err_ref, *,
               dim, chunk, num_chunks):
    # z_ref:    (dim, TN)          channel-major input tile (lane-dense)
    # eaug_ref: (n_e_pad, dim+1)   augmented codebook [-2*e | |e|^2]
    # zq_ref:   (dim, TN)          quantized output tile (lane-dense)
    # idx_ref:  (1, TN)            argmin codebook index per pixel (int32)
    # err_ref:  (1, TN)            per-pixel squared error (summed in wrapper)
    tn = z_ref.shape[-1]

    zc = z_ref[...].astype(jnp.float32)                         # (dim, TN)
    ones = jnp.ones((1, tn), jnp.float32)
    z_aug = jnp.concatenate([zc, ones], axis=0)                 # (dim+1, TN)

    sentinel = jnp.int32(chunk * num_chunks)                    # = n_e_pad

    def body(ci, carry):
        run_min, run_idx, zq_raw = carry
        start = pl.multiple_of(ci * chunk, chunk)
        ea = eaug_ref[pl.ds(start, chunk), :].astype(jnp.float32)  # (chunk, dim+1)

        # d' = |e|^2 - 2 e.z  -- bias and scale folded into one MXU matmul.
        dpr = jnp.dot(ea, z_aug,
                      precision=lax.Precision.HIGHEST,
                      preferred_element_type=jnp.float32)          # (chunk, TN)

        cmin = jnp.min(dpr, axis=0, keepdims=True)                 # (1, TN)
        rows = lax.broadcasted_iota(jnp.int32, dpr.shape, 0) + ci * chunk
        cand = jnp.where(dpr == cmin, rows, sentinel)              # int32, no casts
        cidx = jnp.min(cand, axis=0, keepdims=True)                # first occurrence

        # Gather the selected codewords via a one-hot matmul (MXU), staying in
        # the -2*e scale; unique one-hot (rows == cidx) keeps ties exact.
        onehot = (rows == cidx).astype(jnp.float32)                # (chunk, TN)
        zq_c = lax.dot_general(
            ea[:, :dim], onehot,
            dimension_numbers=(((0,), (0,)), ((), ())),            # contract chunk axis
            precision=lax.Precision.HIGHEST,
            preferred_element_type=jnp.float32)                    # (dim, TN) == -2*e_sel

        better = cmin < run_min        # strict '<': earlier chunk wins ties
        run_min = jnp.where(better, cmin, run_min)
        run_idx = jnp.where(better, cidx, run_idx)
        zq_raw = jnp.where(better, zq_c, zq_raw)
        return run_min, run_idx, zq_raw

    init = (jnp.full((1, tn), jnp.inf, jnp.float32),
            jnp.zeros((1, tn), jnp.int32),
            jnp.zeros((dim, tn), jnp.float32))
    run_min, run_idx, zq_raw = lax.fori_loop(
        0, num_chunks, body, init, unroll=num_chunks <= 4)

    zq_ref[...] = (-0.5 * zq_raw).astype(zq_ref.dtype)   # undo -2 fold (exact)
    idx_ref[...] = run_idx

    # Per-pixel |z - e_idx|^2 = |z|^2 + min_j d'.  NOTE: expanded form can lose
    # precision to cancellation when z ~= e_idx (matches the PyTorch reference,
    # which uses the same expansion); the clamp guards tiny negatives.
    z_sq = jnp.sum(zc * zc, axis=0, keepdims=True)                 # (1, TN)
    err_ref[...] = jnp.maximum(z_sq + run_min, 0.0)


def _pick_tile_n(hw_pad, max_tile_n=1024):
    for t in range(min(max_tile_n, hw_pad), 127, -128):
        if hw_pad % t == 0:
            return t
    return 128


def _pick_chunk(n_e_pad, tile_n, slab_budget_bytes):
    # ~4 live 4-byte (chunk, tile_n) slabs inside the reduction loop body.
    max_elems = max(8 * tile_n, slab_budget_bytes // (4 * 4))
    max_chunk = min(n_e_pad, max(8, (max_elems // tile_n) // 8 * 8))
    for c in range(max_chunk, 7, -8):
        if n_e_pad % c == 0:
            return c
    return 8


def _vmem_limit_bytes():
    # 128 MiB physical on v5e/v6e, 64 MiB per TensorCore on v7x -> ~75% budget.
    try:
        cap = pltpu.get_tpu_info().vmem_capacity_bytes
    except Exception:
        cap = 128 * 1024 * 1024
    return int(min(100 * 1024 * 1024, max(32 * 1024 * 1024, (cap * 3) // 4)))


def vector_quantize_pallas(z_nchw, embedding, *, max_tile_n=1024):
    """z_nchw: (B, D, H, W) float; embedding: (n_e, D) float32.

    Returns (z_q NCHW, flat argmin indices (B*H*W,), sum of squared errors).
    """
    b, d, h, w = z_nchw.shape
    n_e, d2 = embedding.shape
    assert d == d2

    hw = h * w
    hw_pad = ((hw + 127) // 128) * 128
    tile_n = _pick_tile_n(hw_pad, max_tile_n)
    num_tiles = hw_pad // tile_n

    vmem_limit = _vmem_limit_bytes()
    n_e_pad = ((n_e + 7) // 8) * 8
    chunk = _pick_chunk(n_e_pad, tile_n, slab_budget_bytes=vmem_limit // 4)
    num_chunks = n_e_pad // chunk

    z_r = z_nchw.reshape(b, d, hw).astype(jnp.float32)
    if hw_pad != hw:
        # Padded columns are sliced away below (z_q / idx / err all ignored).
        z_r = jnp.pad(z_r, ((0, 0), (0, 0), (0, hw_pad - hw)))

    # Augmented codebook [-2*e | |e|^2]; padded rows get a huge bias so they
    # can never win the argmin.  The -2 scale is undone exactly in the kernel.
    e = embedding.astype(jnp.float32)
    e_sq = jnp.sum(e * e, axis=1, keepdims=True)
    e_aug = jnp.concatenate([-2.0 * e, e_sq], axis=1)            # (n_e, D+1)
    if n_e_pad != n_e:
        pad_rows = jnp.concatenate(
            [jnp.zeros((n_e_pad - n_e, d), jnp.float32),
             jnp.full((n_e_pad - n_e, 1), 1e30, jnp.float32)], axis=1)
        e_aug = jnp.concatenate([e_aug, pad_rows], axis=0)

    kernel = functools.partial(_vq_kernel, dim=d, chunk=chunk,
                               num_chunks=num_chunks)

    zq, idx, err = pl.pallas_call(
        kernel,
        out_shape=(
            jax.ShapeDtypeStruct((b, d, hw_pad), z_nchw.dtype),
            jax.ShapeDtypeStruct((b, 1, hw_pad), jnp.int32),
            jax.ShapeDtypeStruct((b, 1, hw_pad), jnp.float32),
        ),
        grid_spec=pltpu.PrefetchScalarGridSpec(
            num_scalar_prefetch=0,
            grid=(b, num_tiles),
            in_specs=[
                pl.BlockSpec((pl.Squeezed(), d, tile_n),
                             lambda i, j: (i, 0, j)),
                # Grid-constant codebook: single-buffered (saves one full
                # codebook copy in VMEM; matters most on v7x's 64 MiB/TC).
                pl.BlockSpec((n_e_pad, d + 1), lambda i, j: (0, 0),
                             pipeline_mode=pl.Buffered(1)),
            ],
            out_specs=[
                pl.BlockSpec((pl.Squeezed(), d, tile_n),
                             lambda i, j: (i, 0, j)),
                pl.BlockSpec((pl.Squeezed(), 1, tile_n),
                             lambda i, j: (i, 0, j)),
                pl.BlockSpec((pl.Squeezed(), 1, tile_n),
                             lambda i, j: (i, 0, j)),
            ],
        ),
        compiler_params=pltpu.CompilerParams(
            dimension_semantics=("parallel", "parallel"),
            vmem_limit_bytes=vmem_limit),
    )(z_r, e_aug)

    zq = zq[:, :, :hw].reshape(b, d, h, w)
    indices = idx[:, 0, :hw].reshape(-1)
    sse = jnp.sum(err[:, :, :hw])
    return zq, indices, sse


class VectorQuantizerPallas:
    """Forward-pass (inference) semantics of the PyTorch VectorQuantizer."""

    def __init__(self, n_e, e_dim, beta, legacy=True, seed=0):
        self.n_e = n_e
        self.e_dim = e_dim
        self.beta = beta
        self.legacy = legacy
        # Deterministic init matching nn.Embedding.weight.uniform_(-1/n_e, 1/n_e)
        key = jax.random.PRNGKey(seed)
        self.embedding = jax.random.uniform(
            key, (n_e, e_dim), dtype=jnp.float32,
            minval=-1.0 / n_e, maxval=1.0 / n_e)
        # TODO(synk): `remap` / `sane_index_shape` paths not implemented
        # (default constructor args leave them disabled).

    @functools.partial(jax.jit, static_argnums=0)
    def __call__(self, z):
        b, c, h, w = z.shape
        assert c == self.e_dim

        zq, min_encoding_indices, sse = vector_quantize_pallas(
            z, self.embedding)

        mse = sse / z.size
        # legacy:     mean((zq.detach()-z)^2) + beta*mean((zq-z.detach())^2)
        # non-legacy: swaps beta; the forward value is identical either way.
        loss = (1.0 + self.beta) * mse

        # Straight-through: z_q = z + (z_q - z).detach() == z_q (forward value).
        perplexity = None
        min_encodings = None
        return zq, loss, (perplexity, min_encodings, min_encoding_indices)


def _reference(z, embedding, beta):
    b, c, h, w = z.shape
    zf = jnp.transpose(z, (0, 2, 3, 1)).reshape(-1, c)
    cross = jnp.dot(zf, embedding.T, precision=lax.Precision.HIGHEST)
    d = (jnp.sum(zf ** 2, axis=1, keepdims=True)
         + jnp.sum(embedding ** 2, axis=1)
         - 2.0 * cross)
    idx = jnp.argmin(d, axis=1)
    zq = embedding[idx].reshape(b, h, w, c)
    loss = (1.0 + beta) * jnp.mean((zq - jnp.transpose(z, (0, 2, 3, 1))) ** 2)
    zq = jnp.transpose(zq, (0, 3, 1, 2))
    return zq, loss, idx


if __name__ == "__main__":
    B, C, H, W = 2, 4, 16, 16         # C == e_dim
    N_E, BETA = 128, 0.25

    key = jax.random.PRNGKey(0)
    z = jax.random.normal(key, (B, C, H, W), dtype=jnp.float32)

    vq = VectorQuantizerPallas(N_E, C, BETA, seed=0)
    z_q, loss, (_, _, indices) = vq(z)
    jax.block_until_ready((z_q, loss, indices))

    # Sanity check against a pure-JAX reference.
    zq_ref, loss_ref, idx_ref = _reference(z, vq.embedding, BETA)
    assert z_q.shape == (B, C, H, W)
    assert indices.shape == (B * H * W,)
    assert bool(jnp.all(indices == idx_ref.astype(jnp.int32)))
    assert jnp.allclose(z_q, zq_ref, atol=1e-4, rtol=1e-4)
    assert jnp.allclose(loss, loss_ref, atol=1e-4, rtol=1e-4)

    print("KERNEL_OK")
</pallas_src>

<mosaic_0001>
module attributes {stable_mosaic.version = 11 : i64} {
  func.func @_vq_kernel(%arg0: i32, %arg1: i32, %arg2: memref<1x4x256xf32, #tpu.memory_space<vmem>>, %arg3: memref<128x5xf32, #tpu.memory_space<vmem>>, %arg4: memref<1x4x256xf32, #tpu.memory_space<vmem>>, %arg5: memref<1x1x256xi32, #tpu.memory_space<vmem>>, %arg6: memref<1x1x256xf32, #tpu.memory_space<vmem>>) attributes {dimension_semantics = [#tpu.dimension_semantics<parallel>, #tpu.dimension_semantics<parallel>], iteration_bounds = array<i64: 2, 1>, scalar_prefetch = 0 : i64, scratch_operands = 0 : i64, tpu.core_type = #tpu.core_type<tc>, window_params = [{transform_indices = @transform_0, window_bounds = array<i64: 1, 4, 256>}, {pipeline_mode = #tpu.pipeline_mode<synchronous>, transform_indices = @transform_1, window_bounds = array<i64: 128, 5>}, {transform_indices = @transform_2, window_bounds = array<i64: 1, 4, 256>}, {transform_indices = @transform_3, window_bounds = array<i64: 1, 1, 256>}, {transform_indices = @transform_4, window_bounds = array<i64: 1, 1, 256>}]} {
    %c0 = arith.constant 0 : index
    %c0_0 = arith.constant 0 : index
    %c0_1 = arith.constant 0 : index
    %0 = vector.load %arg2[%c0, %c0_0, %c0_1] : memref<1x4x256xf32, #tpu.memory_space<vmem>>, vector<1x4x256xf32>
    %1 = vector.shape_cast %0 : vector<1x4x256xf32> to vector<4x256xf32>
    %cst = arith.constant 1.000000e+00 : f32
    %2 = vector.broadcast %cst : f32 to vector<1x256xf32>
    %3 = tpu.concatenate %1, %2 in 0 : vector<4x256xf32>, vector<1x256xf32> -> vector<5x256xf32>
    %cst_2 = arith.constant 0x7F800000 : f32
    %4 = vector.broadcast %cst_2 : f32 to vector<1x256xf32>
    %c0_i32 = arith.constant 0 : i32
    %5 = vector.broadcast %c0_i32 : i32 to vector<1x256xi32>
    %cst_3 = arith.constant 0.000000e+00 : f32
    %6 = vector.broadcast %cst_3 : f32 to vector<4x256xf32>
    %c128_i32 = arith.constant 128 : i32
    %c0_i32_4 = arith.constant 0 : i32
    %c128_i32_5 = arith.constant 128 : i32
    %7 = arith.muli %c0_i32_4, %c128_i32_5 : i32
    %8 = tpu.assume_multiple %7, 128 : i32
    %9 = arith.index_cast %8 : i32 to index
    %c0_6 = arith.constant 0 : index
    %10 = vector.load %arg3[%9, %c0_6] : memref<128x5xf32, #tpu.memory_space<vmem>>, vector<128x5xf32>
    %cst_7 = arith.constant dense<0.000000e+00> : vector<128x256xf32>
    %11 = tpu.matmul %10, %3, %cst_7 {dimension_numbers = #tpu.dot_dimension_numbers<[1], [0], [0], [1], [0, 0, 1, 1], [], []>, precision = #tpu.contract_precision<fp32>} : vector<128x5xf32>, vector<5x256xf32>, vector<128x256xf32> -> vector<128x256xf32>
    %cst_8 = arith.constant dense<0x7F800000> : vector<256xf32>
    %12 = vector.multi_reduction <minimumf>, %11, %cst_8 [0] : vector<128x256xf32> to vector<256xf32>
    %13 = vector.shape_cast %12 : vector<256xf32> to vector<1x256xf32>
    %14 = tpu.iota {dimensions = array<i32: 0>} : vector<128x256xi32>
    %c128_i32_9 = arith.constant 128 : i32
    %15 = arith.muli %c0_i32_4, %c128_i32_9 : i32
    %16 = vector.broadcast %15 : i32 to vector<128x256xi32>
    %17 = arith.addi %14, %16 : vector<128x256xi32>
    %18 = vector.broadcast %13 : vector<1x256xf32> to vector<128x256xf32>
    %19 = arith.cmpf oeq, %11, %18 : vector<128x256xf32>
    %20 = vector.broadcast %c128_i32 : i32 to vector<128x256xi32>
    %21 = arith.select %19, %17, %20 : vector<128x256xi1>, vector<128x256xi32>
    %cst_10 = arith.constant dense<2147483647> : vector<256xi32>
    %22 = vector.multi_reduction <minsi>, %21, %cst_10 [0] : vector<128x256xi32> to vector<256xi32>
    %23 = vector.shape_cast %22 : vector<256xi32> to vector<1x256xi32>
    %24 = vector.broadcast %23 : vector<1x256xi32> to vector<128x256xi32>
    %25 = arith.cmpi eq, %17, %24 : vector<128x256xi32>
    %26 = arith.extui %25 : vector<128x256xi1> to vector<128x256xi32>
    %27 = arith.sitofp %26 : vector<128x256xi32> to vector<128x256xf32>
    %28 = vector.extract_strided_slice %10 {offsets = [0, 0], sizes = [128, 4], strides = [1, 1]} : vector<128x5xf32> to vector<128x4xf32>
    %cst_11 = arith.constant dense<0.000000e+00> : vector<4x256xf32>
    %29 = tpu.matmul %28, %27, %cst_11 {dimension_numbers = #tpu.dot_dimension_numbers<[0], [0], [1], [1], [0, 1, 1, 1], [], []>, precision = #tpu.contract_precision<fp32>} : vector<128x4xf32>, vector<128x256xf32>, vector<4x256xf32> -> vector<4x256xf32>
    %30 = arith.cmpf olt, %13, %4 : vector<1x256xf32>
    %31 = arith.select %30, %13, %4 : vector<1x256xi1>, vector<1x256xf32>
    %32 = arith.select %30, %23, %5 : vector<1x256xi1>, vector<1x256xi32>
    %33 = vector.shape_cast %30 : vector<1x256xi1> to vector<1x256xi1>
    %34 = vector.broadcast %33 : vector<1x256xi1> to vector<4x256xi1>
    %35 = arith.select %34, %29, %6 : vector<4x256xi1>, vector<4x256xf32>
    %c1_i32 = arith.constant 1 : i32
    %cst_12 = arith.constant -5.000000e-01 : f32
    %36 = vector.broadcast %cst_12 : f32 to vector<4x256xf32>
    %37 = arith.mulf %36, %35 : vector<4x256xf32>
    %c0_13 = arith.constant 0 : index
    %c0_14 = arith.constant 0 : index
    %c0_15 = arith.constant 0 : index
    %38 = vector.load %arg4[%c0_13, %c0_14, %c0_15] : memref<1x4x256xf32, #tpu.memory_space<vmem>>, vector<1x4x256xf32>
    %39 = vector.shape_cast %38 : vector<1x4x256xf32> to vector<4x256xf32>
    %40 = vector.shape_cast %37 : vector<4x256xf32> to vector<1x4x256xf32>
    tpu.vector_store %arg4[%c0_13, %c0_14, %c0_15], %40 {strides = array<i32>} : memref<1x4x256xf32, #tpu.memory_space<vmem>>, vector<1x4x256xf32>,
    %c0_16 = arith.constant 0 : index
    %c0_17 = arith.constant 0 : index
    %c0_18 = arith.constant 0 : index
    %41 = vector.load %arg5[%c0_16, %c0_17, %c0_18] : memref<1x1x256xi32, #tpu.memory_space<vmem>>, vector<1x1x256xi32>
    %42 = vector.shape_cast %41 : vector<1x1x256xi32> to vector<1x256xi32>
    %43 = vector.shape_cast %32 : vector<1x256xi32> to vector<1x1x256xi32>
    tpu.vector_store %arg5[%c0_16, %c0_17, %c0_18], %43 {strides = array<i32>} : memref<1x1x256xi32, #tpu.memory_space<vmem>>, vector<1x1x256xi32>,
    %44 = arith.mulf %1, %1 : vector<4x256xf32>
    %cst_19 = arith.constant dense<0.000000e+00> : vector<256xf32>
    %45 = vector.multi_reduction <add>, %44, %cst_19 [0] : vector<4x256xf32> to vector<256xf32>
    %46 = vector.shape_cast %45 : vector<256xf32> to vector<1x256xf32>
    %47 = arith.addf %46, %31 : vector<1x256xf32>
    %cst_20 = arith.constant 0.000000e+00 : f32
    %48 = vector.broadcast %cst_20 : f32 to vector<1x256xf32>
    %49 = arith.maximumf %47, %48 : vector<1x256xf32>
    %c0_21 = arith.constant 0 : index
    %c0_22 = arith.constant 0 : index
    %c0_23 = arith.constant 0 : index
    %50 = vector.load %arg6[%c0_21, %c0_22, %c0_23] : memref<1x1x256xf32, #tpu.memory_space<vmem>>, vector<1x1x256xf32>
    %51 = vector.shape_cast %50 : vector<1x1x256xf32> to vector<1x256xf32>
    %52 = vector.shape_cast %49 : vector<1x256xf32> to vector<1x1x256xf32>
    tpu.vector_store %arg6[%c0_21, %c0_22, %c0_23], %52 {strides = array<i32>} : memref<1x1x256xf32, #tpu.memory_space<vmem>>, vector<1x1x256xf32>,
    return
  }
  func.func @transform_0(%arg0: i32, %arg1: i32) -> (i32, i32, i32) {
    %c0_i32 = arith.constant 0 : i32
    %c0_i32_0 = arith.constant 0 : i32
    return %arg0, %c0_i32, %arg1 : i32, i32, i32
  }
  func.func @transform_1(%arg0: i32, %arg1: i32) -> (i32, i32) {
    %c0_i32 = arith.constant 0 : i32
    %c0_i32_0 = arith.constant 0 : i32
    %c0_i32_1 = arith.constant 0 : i32
    return %c0_i32, %c0_i32_0 : i32, i32
  }
  func.func @transform_2(%arg0: i32, %arg1: i32) -> (i32, i32, i32) {
    %c0_i32 = arith.constant 0 : i32
    %c0_i32_0 = arith.constant 0 : i32
    return %arg0, %c0_i32, %arg1 : i32, i32, i32
  }
  func.func @transform_3(%arg0: i32, %arg1: i32) -> (i32, i32, i32) {
    %c0_i32 = arith.constant 0 : i32
    %c0_i32_0 = arith.constant 0 : i32
    return %arg0, %c0_i32, %arg1 : i32, i32, i32
  }
  func.func @transform_4(%arg0: i32, %arg1: i32) -> (i32, i32, i32) {
    %c0_i32 = arith.constant 0 : i32
    %c0_i32_0 = arith.constant 0 : i32
    return %arg0, %c0_i32, %arg1 : i32, i32, i32
  }
}

</mosaic_0001>

<bundles_post_ra>
// kernel: a_call__.1
= control target key start
LH: loop header
LB: loop body
LE: loop exit
PB: predicated region body
PF: predicated region fallthrough
CT: control target
= control target key end

     0   :  { %10 = vsyncpa [#allocation3], 0  ;;  %s5387_s0 = inlined_call_operand.vmem [shape: f32[2,4,256], index: 0, kind: input, shape index: {}]   ;;  %s5388_s1 = inlined_call_operand.vmem [shape: f32[128,5], index: 1, kind: input, shape index: {}]   ;;  %s5389_s2 = inlined_call_operand.vmem [shape: f32[2,4,256], index: 2, kind: output, shape index: {0}]   ;;  %s5390_s3 = inlined_call_operand.hbm [shape: s32[2,1,256], index: 3, kind: output, shape index: {1}]   ;;  %s5391_s4 = inlined_call_operand.vmem [shape: f32[2,1,256], index: 4, kind: output, shape index: {2}]  }
   0x1   :  { %12 = vsyncpa [#allocation3 + $0x1], 0  ;;  %s3316_s15 = smov 0   ;;  %s3318_s16 = smov 0  }
   0x2   :  { %s3320_s17 = smov 0   ;;  %s3322_s18 = smov 0  }
   0x3   :  { %s3324_s19 = smov 0   ;;  %s3326_s20 = smov 0  }
   0x4 LB: > { %s3002_s21 = sadd.s32 4294967295, %s3285_s20   ;;  %s3003_s22 = sadd.s32 4294967294, %s3285_s20   ;;  %s3285_s20 = sphi %s3326_s20, %s18_s20   ;;  %s3281_s19 = sphi %s3324_s19, %s5586_s19   ;;  %s3277_s18 = sphi %s3322_s18, %s5585_s18   ;;  %s3273_s17 = sphi %s3320_s17, %s5584_s17   ;;  %s3269_s16 = sphi %s3318_s16, %s5583_s16   ;;  %s3265_s15 = sphi %s3316_s15, %s5582_s15  }
   0x5   : > { %s30_s23 = sadd.s32 1, %s3281_s19  ;;  %s116_s24 = sadd.s32 1, %s3273_s17 }
   0x6   : > { %p32_p0 = scmp.ge.s32.totalorder %s30_s23, 2  ;;  %p126_p1 = scmp.ne.s32.totalorder %s3273_s17, %s3269_s16 }
   0x7   : > { %p127_p2 = scmp.eq.s32.totalorder %s3002_s21, 1  ;;  %p132_p3 = scmp.ne.s32.totalorder %s3269_s16, %s3265_s15 }
   0x8   : > { %s5588_s23 = smov (%p32_p0, %s30_s23), 0  ;;  %p133_p5 = scmp.eq.s32.totalorder %s3003_s22, 1 }
   0x9   : > { %p3356_p4 = por %p127_p2, %p126_p1  ;;  %s111_s26 = ssub.s32 %s3281_s19, %s5588_s23 }
   0xa   : > { %p3006_p6 = scmp.ge.s32.totalorder %s3285_s20, 1  ;;  %p114_p7 = scmp.eq.s32.totalorder %s111_s26, 0 }
   0xb   : > { %p3363_p8 = por %p133_p5, %p132_p3  ;;  %p195_p9 = scmp.lt.s32.totalorder %s3285_s20, 3 }
   0xc   : > { %s3369_s28 = scalar_select %p114_p7, %s3273_s17, %s116_s24  }
   0xd   : > { %p196_p10 = pnand %p3006_p6, %p195_p9 }
   0xf   : > { %199 = sbr.rel (%p196_p10) target bundleno = 809 (0x329), region = 28 }
  0x14   : > { %p243_p11 = scmp.lt.s32.totalorder %s3277_s18, 1  ;;  %v279_v0 = vld [vmem:[%s5388_s1] sm:$0xff]  ;;  %vm295_vm0 = vcmask 39936   ;;  %v5393_v1 = vmov 0.0   ;;  %v280_v3 = vld [vmem:[%s5388_s1 + $0x8] sm:$0xff]  ;;  %v281_v4 = vld [vmem:[%s5388_s1 + $0x10] sm:$0xff] }
  0x15   : > { %417 = vmatprep.mubr.f32.mxu0 %v5393_v1  ;;  %v297_v2 = vsel %vm295_vm0, %v279_v0, 0  ;;  %668 = vmatprep.mubr.f32.mxu1 %v5393_v1  ;;  %v282_v5 = vld [vmem:[%s5388_s1 + $0x18] sm:$0xff]  ;;  %v300_v7 = vsel %vm295_vm0, %v280_v3, 0  ;;  %v303_v8 = vsel %vm295_vm0, %v281_v4, 0  ;;  %v3402_v12 = vld [vmem:[%s5388_s1 + $0x20] sm:$0xff]  ;;  %vm276_vm1 = vcmask 1043456  }
  0x16   : > { %s3388_s11 = scalar_select %p243_p11, %s3277_s18, 1  ;;  %v3390_v6 = vand.u32 4294901760, %v297_v2  ;;  %v3394_v9 = vand.u32 4294901760, %v300_v7  ;;  %v3396_v10 = vand.u32 4294901760, %v303_v8  ;;  %v306_v11 = vsel %vm295_vm0, %v282_v5, 0  ;;  %1848 = vxpose.xlu0.b32.start [1/16] (narrow) %v279_v0, 8 }
  0x17   : > { %vm344_vm2 = vcmask 1044480   ;;  %v3423_v18 = vand.u32 4294901760, %v306_v11  ;;  %v309_v19 = vsel %vm295_vm0, %v3402_v12, 0  ;;  %v284_v23 = vld [vmem:[%s5388_s1 + $0x28] sm:$0xff]  ;;  %v285_v37 = vld [vmem:[%s5388_s1 + $0x30] sm:$0xff]  ;;  %v286_v49 = vld [vmem:[%s5388_s1 + $0x38] sm:$0xff] }
  0x18   : > { %s3146_s14 = sshll.u32 %s3388_s11, 3  ;;  %v3406_v13 = vsub.f32 %v297_v2, %v3390_v6  ;;  %v3416_v14 = vsub.f32 %v300_v7, %v3394_v9  ;;  %v3421_v17 = vsub.f32 %v303_v8, %v3396_v10  ;;  %v3439_v28 = vand.u32 4294901760, %v309_v19  ;;  %v287_v58 = vld [vmem:[%s5388_s1 + $0x40] sm:$0xff]  ;;  %v288_v2 = vld [vmem:[%s5388_s1 + $0x48] sm:$0xff]  ;;  %s229_s12 = sand.u32 1, %s3269_s16  }
  0x19   : > { %s3413_s24 = scalar_lea.vmem %s5387_s0, %s3146_s14  ;;  %v3444_v31 = vsub.f32 %v306_v11, %v3423_v18  ;;  %v312_v32 = vsel %vm295_vm0, %v284_v23, 0  ;;  %v315_v43 = vsel %vm295_vm0, %v285_v37, 0  ;;  %v318_v57 = vsel %vm295_vm0, %v286_v49, 0  ;;  %s4965_s26 = sshll.u32 %s229_s12, 1 }
  0x1a   : > { %v272_v15 = vld [vmem:[%s3413_s24] sm:$0xff]  ;;  %v420_v16 = vand.u32 4294901760, %v3406_v13  ;;  %v431_v22 = vand.u32 4294901760, %v3416_v14  ;;  %1849 = vxpose.xlu0.b32.cont [2/16] (narrow) %v280_v3, 8  ;;  %v442_v30 = vand.u32 4294901760, %v3421_v17  ;;  %v3464_v41 = vsub.f32 %v309_v19, %v3439_v28  ;;  %s231_s29 = scalar_lea.vmem [#allocation2], %s4965_s26 }
  0x1b   : > { %v274_v20 = vcombine.high %v272_v15, %v272_v15  ;;  %v277_v21 = vsel %vm276_vm1, %v272_v15, 1.0  ;;  %v453_v40 = vand.u32 4294901760, %v3444_v31  ;;  %v3466_v42 = vand.u32 4294901760, %v312_v32  ;;  %s3148_s30 = sshll.u32 %s3277_s18, 5  ;;  %s2853_s8 = sshll.u32 %s231_s29, 4  ;;  %s2854_s8 = int_to_ptr.vmem [resolvable:$true] %s2853_s8 }
  0x1c   : > { %v346_v24 = vsel %vm344_vm2, %v277_v21, 0  ;;  %v421_v25 = vsub.f32 %v3406_v13, %v420_v16  ;;  %v432_v35 = vsub.f32 %v3416_v14, %v431_v22  ;;  %v443_v47 = vsub.f32 %v3421_v17, %v442_v30  ;;  %s2851_s7 = scalar_lea.hbm %s5390_s3, %s3148_s30  ;;  %s2825_s9 = scalar_lea.sflag [#allocation3], %s229_s12 }
  0x1d   : > { %v278_v26 = vsel %vm276_vm1, %v274_v20, 1.0  ;;  %v3437_v27 = vand.u32 4294901760, %v346_v24  ;;  %v464_v51 = vand.u32 4294901760, %v3464_v41  ;;  %v3481_v52 = vand.u32 4294901760, %v315_v43  ;;  %s3209_s10 = scalar_lea.vmem %s2854_s8, 32 }
  0x1e   : > { %v349_v29 = vsel %vm344_vm2, %v278_v26, 0  ;;  %v422_v34 = vand.u32 4294901760, %v421_v25  ;;  %1850 = vxpose.xlu0.b32.cont [3/16] (narrow) %v281_v4, 8  ;;  %v433_v44 = vand.u32 4294901760, %v432_v35  ;;  %v444_v54 = vand.u32 4294901760, %v443_v47  ;;  %v290_v25 = vld [vmem:[%s5388_s1 + $0x58] sm:$0xff]  ;;  %p3210_p12 = scmp.ne.s32.totalorder %s2854_s8, %s3209_s10 }
  0x1f   : > { %v3447_v33 = vand.u32 4294901760, %v349_v29  ;;  %v3453_v36 = vsub.f32 %v346_v24, %v3437_v27  ;;  %v454_v55 = vsub.f32 %v3444_v31, %v453_v40  ;;  %v3487_v56 = vsub.f32 %v312_v32, %v3466_v42 }
  0x20   : > { %v465_v59 = vsub.f32 %v3464_v41, %v464_v51  ;;  %v3499_v60 = vsub.f32 %v315_v43, %v3481_v52  ;;  %v3503_v63 = vand.u32 4294901760, %v318_v57  ;;  %v321_v0 = vsel %vm295_vm0, %v287_v58, 0  ;;  %p3211_p13 = pnand %p3210_p12, %p3356_p4 }
  0x21   : > { %382 = vmatprep.subr.mxu0 %v3447_v33  ;;  %v625_v38 = vsub.f32 %v349_v29, %v3447_v33  ;;  %v632_v39 = vand.u32 4294901760, %v3453_v36  ;;  %v455_v61 = vand.u32 4294901760, %v454_v55  ;;  %v475_v62 = vand.u32 4294901760, %v3487_v56 }
  0x22   : > { %384 = vmatpush1.msra.mxu0 %v3437_v27  ;;  %1851 = vxpose.xlu0.b32.cont [4/16] (narrow) %v282_v5, 8  ;;  %v466_v3 = vand.u32 4294901760, %v465_v59  ;;  %v486_v4 = vand.u32 4294901760, %v3499_v60  ;;  %v3519_v7 = vsub.f32 %v318_v57, %v3503_v63  ;;  %v3521_v8 = vand.u32 4294901760, %v321_v0  ;;  %p3212_p0 = pneg %p3211_p13 }
  0x23   : > { %423 = vmatmul.mubr.f32.vlgmr.msra.gmra.mxu0 %v422_v34  ;;  %v626_v45 = vand.u32 4294901760, %v625_v38  ;;  %v633_v46 = vsub.f32 %v3453_v36, %v632_v39  ;;  %813 = vmatprep.subr.mxu0 %v625_v38  ;;  %v476_v5 = vsub.f32 %v3487_v56, %v475_v62  ;;  %v324_v11 = vsel %vm295_vm0, %v288_v2, 0 }
  0x24   : > { %428 = vmatprep.mubr.f32.mxu0 %v5393_v1  ;;  %816 = vmatpush1.msra.mxu0 %v3453_v36  ;;  %v487_v15 = vsub.f32 %v3499_v60, %v486_v4  ;;  %v3533_v19 = vand.u32 4294901760, %v324_v11  ;;  %v497_v21 = vand.u32 4294901760, %v3519_v7  ;;  %v330_v35 = vsel %vm295_vm0, %v290_v25, 0 }
  0x25   : > { %v627_v48 = vsub.f32 %v625_v38, %v626_v45  ;;  %1222 = vmatprep.subr.mxu0 %v626_v45  ;;  %v634_v50 = vand.u32 4294901760, %v633_v46  ;;  %v477_v20 = vand.u32 4294901760, %v476_v5  ;;  %v3570_v46 = vand.u32 4294901760, %v330_v35  ;;  %v294_v5 = vld [vmem:[%s5388_s1 + $0x78] sm:$0xff] }
  0x26   : > { %1852 = vxpose.xlu0.b32.cont [5/16] (narrow) %v3402_v12, 8  ;;  %v289_v12 = vld [vmem:[%s5388_s1 + $0x50] sm:$0xff]  ;;  %v3547_v26 = vsub.f32 %v324_v11, %v3533_v19  ;;  %v488_v32 = vand.u32 4294901760, %v487_v15  ;;  %v342_v15 = vsel %vm295_vm0, %v294_v5, 0 }
  0x27   : > { %434 = vmatmul.mubr.f32.gmra.mxu0 %v433_v44  ;;  %v628_v53 = vand.u32 4294901760, %v627_v48  ;;  %v327_v24 = vsel %vm295_vm0, %v289_v12, 0  ;;  %v292_v48 = vld [vmem:[%s5388_s1 + $0x68] sm:$0xff]  ;;  %v3587_v57 = vsub.f32 %v330_v35, %v3570_v46 }
  0x28   : > { %439 = vmatprep.mubr.f32.mxu0 %v5393_v1  ;;  %v3549_v29 = vand.u32 4294901760, %v327_v24  ;;  %v519_v38 = vand.u32 4294901760, %v3547_v26 }
  0x29   : > { %629 = vmatprep.subr.mxu1 %v628_v53 }
  0x2a   : > { %635 = vmatpush1.msra.mxu1 %v634_v50  ;;  %1853 = vxpose.xlu0.b32.cont [6/16] (narrow) %v284_v23, 8  ;;  %v3538_v23 = vsub.f32 %v321_v0, %v3521_v8  ;;  %v3564_v43 = vsub.f32 %v327_v24, %v3549_v29  ;;  %v336_v50 = vsel %vm295_vm0, %v292_v48, 0 }
  0x2b   : > { %445 = vmatmul.mubr.f32.gmra.mxu0 %v444_v54  ;;  %670 = vmatmul.mubr.f32.vlgmr.msra.gmra.mxu1 %v3390_v6  ;;  %v520_v54 = vsub.f32 %v3547_v26, %v519_v38  ;;  %v3594_v59 = vand.u32 4294901760, %v336_v50 }
  0x2c   : > { %450 = vmatprep.mubr.f32.mxu0 %v5393_v1  ;;  %675 = vmatprep.mubr.f32.mxu1 %v5393_v1  ;;  %v508_v34 = vand.u32 4294901760, %v3538_v23  ;;  %v530_v55 = vand.u32 4294901760, %v3564_v43 }
  0x2d   : > { %1009 = vmatprep.subr.mxu1 %v3447_v33 }
  0x2e   : > { %1011 = vmatpush1.msra.mxu1 %v3437_v27  ;;  %1854 = vxpose.xlu0.b32.cont [7/16] (narrow) %v285_v37, 8  ;;  %v291_v37 = vld [vmem:[%s5388_s1 + $0x60] sm:$0xff]  ;;  %v509_v45 = vsub.f32 %v3538_v23, %v508_v34  ;;  %v531_v0 = vsub.f32 %v3564_v43, %v530_v55 }
  0x2f   : > { %456 = vmatmul.mubr.f32.gmra.mxu0 %v455_v61  ;;  %677 = vmatmul.mubr.f32.gmra.mxu1 %v3394_v9  ;;  %v333_v47 = vsel %vm295_vm0, %v291_v37, 0  ;;  %v521_v61 = vand.u32 4294901760, %v520_v54 }
  0x30   : > { %461 = vmatprep.mubr.f32.mxu0 %v5393_v1  ;;  %682 = vmatprep.mubr.f32.mxu1 %v5393_v1  ;;  %v510_v53 = vand.u32 4294901760, %v509_v45 }
  0x31   : > { %1403 = vmatprep.subr.mxu1 %v3447_v33  ;;  %v498_v33 = vsub.f32 %v3519_v7, %v497_v21 }
  0x32   : > { %1855 = vxpose.xlu0.b32.cont [8/16] (narrow) %v286_v49, 8  ;;  %v3578_v49 = vand.u32 4294901760, %v333_v47 }
  0x33   : > { %467 = vmatmul.mubr.f32.gmra.mxu0 %v466_v3  ;;  %684 = vmatmul.mubr.f32.gmra.mxu1 %v3396_v10  ;;  %v499_v44 = vand.u32 4294901760, %v498_v33 }
  0x34   : > { %472 = vmatprep.mubr.f32.mxu0 %v5393_v1  ;;  %689 = vmatprep.mubr.f32.mxu1 %v5393_v1  ;;  %v3602_v3 = vsub.f32 %v333_v47, %v3578_v49 }
  0x36   : > { %1856 = vxpose.xlu0.b32.cont [9/16] (narrow) %v287_v58, 8  ;;  %v293_v58 = vld [vmem:[%s5388_s1 + $0x70] sm:$0xff] }
  0x37   : > { %478 = vmatmul.mubr.f32.gmra.mxu0 %v477_v20  ;;  %691 = vmatmul.mubr.f32.gmra.mxu1 %v3423_v18  ;;  %v339_v11 = vsel %vm295_vm0, %v293_v58, 0  ;;  %v532_v20 = vand.u32 4294901760, %v531_v0 }
  0x38   : > { %483 = vmatprep.mubr.f32.mxu0 %v5393_v1  ;;  %696 = vmatprep.mubr.f32.mxu1 %v5393_v1  ;;  %v3619_v33 = vand.u32 4294901760, %v339_v11 }
  0x3a   : > { %1857 = vxpose.xlu0.b32.cont [10/16] (narrow) %v288_v2, 8  ;;  %v541_v2 = vand.u32 4294901760, %v3587_v57  ;;  %v3631_v47 = vsub.f32 %v339_v11, %v3619_v33 }
  0x3b   : > { %489 = vmatmul.mubr.f32.gmra.mxu0 %v488_v32  ;;  %698 = vmatmul.mubr.f32.gmra.mxu1 %v3439_v28  ;;  %v552_v32 = vand.u32 4294901760, %v3602_v3 }
  0x3c   : > { %494 = vmatprep.mubr.f32.mxu0 %v5393_v1  ;;  %703 = vmatprep.mubr.f32.mxu1 %v5393_v1  ;;  %v542_v24 = vsub.f32 %v3587_v57, %v541_v2 }
  0x3e   : > { %1858 = vxpose.xlu0.b32.cont [11/16] (narrow) %v289_v12, 8  ;;  %v3611_v12 = vsub.f32 %v336_v50, %v3594_v59  ;;  %v543_v35 = vand.u32 4294901760, %v542_v24 }
  0x3f   : > { %500 = vmatmul.mubr.f32.gmra.mxu0 %v499_v44  ;;  %705 = vmatmul.mubr.f32.gmra.mxu1 %v3466_v42  ;;  %v553_v44 = vsub.f32 %v3602_v3, %v552_v32 }
  0x40   : > { %505 = vmatprep.mubr.f32.mxu0 %v5393_v1  ;;  %710 = vmatprep.mubr.f32.mxu1 %v5393_v1  ;;  %v563_v45 = vand.u32 4294901760, %v3611_v12 }
  0x42   : > { %1859 = vxpose.xlu0.b32.cont [12/16] (narrow) %v290_v25, 8  ;;  %v3623_v25 = vand.u32 4294901760, %v342_v15  ;;  %v564_v50 = vsub.f32 %v3611_v12, %v563_v45 }
  0x43   : > { %511 = vmatmul.mubr.f32.gmra.mxu0 %v510_v53  ;;  %712 = vmatmul.mubr.f32.gmra.mxu1 %v3481_v52  ;;  %v574_v53 = vand.u32 4294901760, %v3631_v47 }
  0x44   : > { %516 = vmatprep.mubr.f32.mxu0 %v5393_v1  ;;  %717 = vmatprep.mubr.f32.mxu1 %v5393_v1  ;;  %v3641_v54 = vsub.f32 %v342_v15, %v3623_v25 }
  0x46   : > { %1860 = vxpose.xlu0.b32.cont [13/16] (narrow) %v291_v37, 8  ;;  %v554_v37 = vand.u32 4294901760, %v553_v44  ;;  %v585_v0 = vand.u32 4294901760, %v3641_v54 }
  0x47   : > { %522 = vmatmul.mubr.f32.gmra.mxu0 %v521_v61  ;;  %719 = vmatmul.mubr.f32.gmra.mxu1 %v3503_v63  ;;  %v575_v61 = vsub.f32 %v3631_v47, %v574_v53 }
  0x48   : > { %527 = vmatprep.mubr.f32.mxu0 %v5393_v1  ;;  %724 = vmatprep.mubr.f32.mxu1 %v5393_v1 }
  0x49   : > { %v576_v11 = vand.u32 4294901760, %v575_v61 }
  0x4a   : > { %1861 = vxpose.xlu0.b32.cont [14/16] (narrow) %v292_v48, 8  ;;  %v565_v48 = vand.u32 4294901760, %v564_v50 }
  0x4b   : > { %533 = vmatmul.mubr.f32.gmra.mxu0 %v532_v20  ;;  %726 = vmatmul.mubr.f32.gmra.mxu1 %v3521_v8 }
  0x4c   : > { %538 = vmatprep.mubr.f32.mxu0 %v5393_v1  ;;  %731 = vmatprep.mubr.f32.mxu1 %v5393_v1 }
  0x4e   : > { %1862 = vxpose.xlu0.b32.cont [15/16] (narrow) %v293_v58, 8  ;;  %v586_v58 = vsub.f32 %v3641_v54, %v585_v0 }
  0x4f   : > { %544 = vmatmul.mubr.f32.gmra.mxu0 %v543_v35  ;;  %733 = vmatmul.mubr.f32.gmra.mxu1 %v3533_v19 }
  0x50   : > { %549 = vmatprep.mubr.f32.mxu0 %v5393_v1  ;;  %738 = vmatprep.mubr.f32.mxu1 %v5393_v1  ;;  %v587_v15 = vand.u32 4294901760, %v586_v58 }
  0x52   : > { %1863 = vxpose.xlu0.b32.end [16/16] (narrow) %v294_v5, 8 }
  0x53   : > { %555 = vmatmul.mubr.f32.gmra.mxu0 %v554_v37  ;;  %740 = vmatmul.mubr.f32.gmra.mxu1 %v3549_v29 }
  0x54   : > { %560 = vmatprep.mubr.f32.mxu0 %v5393_v1  ;;  %745 = vmatprep.mubr.f32.mxu1 %v5393_v1 }
  0x57   : > { %566 = vmatmul.mubr.f32.gmra.mxu0 %v565_v48  ;;  %747 = vmatmul.mubr.f32.gmra.mxu1 %v3570_v46 }
  0x58   : > { %571 = vmatprep.mubr.f32.mxu0 %v5393_v1  ;;  %752 = vmatprep.mubr.f32.mxu1 %v5393_v1 }
  0x5b   : > { %577 = vmatmul.mubr.f32.gmra.mxu0 %v576_v11  ;;  %754 = vmatmul.mubr.f32.gmra.mxu1 %v3578_v49 }
  0x5c   : > { %582 = vmatprep.mubr.f32.mxu0 %v5393_v1  ;;  %759 = vmatprep.mubr.f32.mxu1 %v5393_v1 }
  0x5f   : > { %588 = vmatmul.mubr.f32.gmra.mxu0 %v587_v15  ;;  %761 = vmatmul.mubr.f32.gmra.mxu1 %v3594_v59 }
  0x60   : > { %766 = vmatprep.mubr.f32.mxu1 %v5393_v1  ;;  %849 = vmatprep.mubr.f32.mxu0 %v5393_v1 }
  0x63   : > { %768 = vmatmul.mubr.f32.gmra.mxu1 %v3619_v33  ;;  %852 = vmatmul.mubr.f32.vlgmr.msra.gmra.mxu0 %v3406_v13 }
  0x64   : > { %773 = vmatprep.mubr.f32.mxu1 %v5393_v1  ;;  %857 = vmatprep.mubr.f32.mxu0 %v5393_v1 }
  0x65   : > { %1226 = vmatpush1.msra.mxu0 %v632_v39 }
  0x67   : > { %775 = vmatmul.mubr.f32.gmra.mxu1 %v3623_v25  ;;  %860 = vmatmul.mubr.f32.gmra.mxu0 %v3416_v14 }
  0x68   : > { %865 = vmatprep.mubr.f32.mxu0 %v5393_v1  ;;  %1044 = vmatprep.mubr.f32.mxu1 %v5393_v1 }
  0x6b   : > { %868 = vmatmul.mubr.f32.gmra.mxu0 %v3421_v17  ;;  %1048 = vmatmul.mubr.f32.vlgmr.msra.gmra.mxu1 %v420_v16 }
  0x6c   : > { %873 = vmatprep.mubr.f32.mxu0 %v5393_v1  ;;  %1053 = vmatprep.mubr.f32.mxu1 %v5393_v1 }
  0x6d   : > { %1405 = vmatpush1.msra.mxu1 %v3437_v27 }
  0x6f   : > { %876 = vmatmul.mubr.f32.gmra.mxu0 %v3444_v31  ;;  %1057 = vmatmul.mubr.f32.gmra.mxu1 %v431_v22 }
  0x70   : > { %881 = vmatprep.mubr.f32.mxu0 %v5393_v1  ;;  %1062 = vmatprep.mubr.f32.mxu1 %v5393_v1 }
  0x73   : > { %884 = vmatmul.mubr.f32.gmra.mxu0 %v3464_v41  ;;  %1066 = vmatmul.mubr.f32.gmra.mxu1 %v442_v30 }
  0x74   : > { %889 = vmatprep.mubr.f32.mxu0 %v5393_v1  ;;  %1071 = vmatprep.mubr.f32.mxu1 %v5393_v1 }
  0x77   : > { %892 = vmatmul.mubr.f32.gmra.mxu0 %v3487_v56  ;;  %1075 = vmatmul.mubr.f32.gmra.mxu1 %v453_v40 }
  0x78   : > { %897 = vmatprep.mubr.f32.mxu0 %v5393_v1  ;;  %1080 = vmatprep.mubr.f32.mxu1 %v5393_v1 }
  0x7b   : > { %900 = vmatmul.mubr.f32.gmra.mxu0 %v3499_v60  ;;  %1084 = vmatmul.mubr.f32.gmra.mxu1 %v464_v51 }
  0x7c   : > { %905 = vmatprep.mubr.f32.mxu0 %v5393_v1  ;;  %1089 = vmatprep.mubr.f32.mxu1 %v5393_v1 }
  0x7f   : > { %908 = vmatmul.mubr.f32.gmra.mxu0 %v3519_v7  ;;  %1093 = vmatmul.mubr.f32.gmra.mxu1 %v475_v62 }
  0x80   : > { %913 = vmatprep.mubr.f32.mxu0 %v5393_v1  ;;  %1098 = vmatprep.mubr.f32.mxu1 %v5393_v1 }
  0x83   : > { %916 = vmatmul.mubr.f32.gmra.mxu0 %v3538_v23  ;;  %1102 = vmatmul.mubr.f32.gmra.mxu1 %v486_v4 }
  0x84   : > { %921 = vmatprep.mubr.f32.mxu0 %v5393_v1  ;;  %1107 = vmatprep.mubr.f32.mxu1 %v5393_v1 }
  0x87   : > { %924 = vmatmul.mubr.f32.gmra.mxu0 %v3547_v26  ;;  %1111 = vmatmul.mubr.f32.gmra.mxu1 %v497_v21 }
  0x88   : > { %929 = vmatprep.mubr.f32.mxu0 %v5393_v1  ;;  %1116 = vmatprep.mubr.f32.mxu1 %v5393_v1 }
  0x8b   : > { %932 = vmatmul.mubr.f32.gmra.mxu0 %v3564_v43  ;;  %1120 = vmatmul.mubr.f32.gmra.mxu1 %v508_v34 }
  0x8c   : > { %937 = vmatprep.mubr.f32.mxu0 %v5393_v1  ;;  %1125 = vmatprep.mubr.f32.mxu1 %v5393_v1 }
  0x8f   : > { %940 = vmatmul.mubr.f32.gmra.mxu0 %v3587_v57  ;;  %1129 = vmatmul.mubr.f32.gmra.mxu1 %v519_v38 }
  0x90   : > { %945 = vmatprep.mubr.f32.mxu0 %v5393_v1  ;;  %1134 = vmatprep.mubr.f32.mxu1 %v5393_v1 }
  0x93   : > { %948 = vmatmul.mubr.f32.gmra.mxu0 %v3602_v3  ;;  %1138 = vmatmul.mubr.f32.gmra.mxu1 %v530_v55 }
  0x94   : > { %953 = vmatprep.mubr.f32.mxu0 %v5393_v1  ;;  %1143 = vmatprep.mubr.f32.mxu1 %v5393_v1 }
  0x97   : > { %956 = vmatmul.mubr.f32.gmra.mxu0 %v3611_v12  ;;  %1147 = vmatmul.mubr.f32.gmra.mxu1 %v541_v2 }
  0x98   : > { %961 = vmatprep.mubr.f32.mxu0 %v5393_v1  ;;  %1152 = vmatprep.mubr.f32.mxu1 %v5393_v1 }
  0x9b   : > { %964 = vmatmul.mubr.f32.gmra.mxu0 %v3631_v47  ;;  %1156 = vmatmul.mubr.f32.gmra.mxu1 %v552_v32 }
  0x9c   : > { %969 = vmatprep.mubr.f32.mxu0 %v5393_v1  ;;  %1161 = vmatprep.mubr.f32.mxu1 %v5393_v1 }
  0x9f   : > { %972 = vmatmul.mubr.f32.gmra.mxu0 %v3641_v54  ;;  %1165 = vmatmul.mubr.f32.gmra.mxu1 %v563_v45 }
  0xa0   : > { %1170 = vmatprep.mubr.f32.mxu1 %v5393_v1  ;;  %1259 = vmatprep.mubr.f32.mxu0 %v5393_v1 }
  0xa3   : > { %1174 = vmatmul.mubr.f32.gmra.mxu1 %v574_v53  ;;  %1261 = vmatmul.mubr.f32.vlgmr.msra.gmra.mxu0 %v3390_v6 }
  0xa4   : > { %1179 = vmatprep.mubr.f32.mxu1 %v5393_v1  ;;  %1266 = vmatprep.mubr.f32.mxu0 %v5393_v1 }
  0xa7   : > { %1183 = vmatmul.mubr.f32.gmra.mxu1 %v585_v0  ;;  %1268 = vmatmul.mubr.f32.gmra.mxu0 %v3394_v9 }
  0xa8   : > { %1273 = vmatprep.mubr.f32.mxu0 %v5393_v1  ;;  %1438 = vmatprep.mubr.f32.mxu1 %v5393_v1 }
  0xab   : > { %1275 = vmatmul.mubr.f32.gmra.mxu0 %v3396_v10  ;;  %1440 = vmatmul.mubr.f32.vlgmr.msra.gmra.mxu1 %v3390_v6 }
  0xac   : > { %1280 = vmatprep.mubr.f32.mxu0 %v5393_v1  ;;  %1445 = vmatprep.mubr.f32.mxu1 %v5393_v1 }
  0xaf   : > { %1282 = vmatmul.mubr.f32.gmra.mxu0 %v3423_v18  ;;  %1447 = vmatmul.mubr.f32.gmra.mxu1 %v3394_v9 }
  0xb0   : > { %1287 = vmatprep.mubr.f32.mxu0 %v5393_v1  ;;  %1452 = vmatprep.mubr.f32.mxu1 %v5393_v1 }
  0xb3   : > { %1289 = vmatmul.mubr.f32.gmra.mxu0 %v3439_v28  ;;  %1454 = vmatmul.mubr.f32.gmra.mxu1 %v3396_v10 }
  0xb4   : > { %1294 = vmatprep.mubr.f32.mxu0 %v5393_v1  ;;  %1459 = vmatprep.mubr.f32.mxu1 %v5393_v1 }
  0xb7   : > { %1296 = vmatmul.mubr.f32.gmra.mxu0 %v3466_v42  ;;  %1461 = vmatmul.mubr.f32.gmra.mxu1 %v3423_v18 }
  0xb8   : > { %1301 = vmatprep.mubr.f32.mxu0 %v5393_v1  ;;  %1466 = vmatprep.mubr.f32.mxu1 %v5393_v1 }
  0xbb   : > { %1303 = vmatmul.mubr.f32.gmra.mxu0 %v3481_v52  ;;  %1468 = vmatmul.mubr.f32.gmra.mxu1 %v3439_v28 }
  0xbc   : > { %1308 = vmatprep.mubr.f32.mxu0 %v5393_v1  ;;  %1473 = vmatprep.mubr.f32.mxu1 %v5393_v1 }
  0xbf   : > { %1310 = vmatmul.mubr.f32.gmra.mxu0 %v3503_v63  ;;  %1475 = vmatmul.mubr.f32.gmra.mxu1 %v3466_v42 }
  0xc0   : > { %1315 = vmatprep.mubr.f32.mxu0 %v5393_v1  ;;  %1480 = vmatprep.mubr.f32.mxu1 %v5393_v1 }
  0xc3   : > { %1317 = vmatmul.mubr.f32.gmra.mxu0 %v3521_v8  ;;  %1482 = vmatmul.mubr.f32.gmra.mxu1 %v3481_v52 }
  0xc4   : > { %1322 = vmatprep.mubr.f32.mxu0 %v5393_v1  ;;  %1487 = vmatprep.mubr.f32.mxu1 %v5393_v1 }
  0xc7   : > { %1324 = vmatmul.mubr.f32.gmra.mxu0 %v3533_v19  ;;  %1489 = vmatmul.mubr.f32.gmra.mxu1 %v3503_v63 }
  0xc8   : > { %1329 = vmatprep.mubr.f32.mxu0 %v5393_v1  ;;  %1494 = vmatprep.mubr.f32.mxu1 %v5393_v1 }
  0xcb   : > { %1331 = vmatmul.mubr.f32.gmra.mxu0 %v3549_v29  ;;  %1496 = vmatmul.mubr.f32.gmra.mxu1 %v3521_v8 }
  0xcc   : > { %1336 = vmatprep.mubr.f32.mxu0 %v5393_v1  ;;  %1501 = vmatprep.mubr.f32.mxu1 %v5393_v1 }
  0xcf   : > { %1338 = vmatmul.mubr.f32.gmra.mxu0 %v3570_v46  ;;  %1503 = vmatmul.mubr.f32.gmra.mxu1 %v3533_v19 }
  0xd0   : > { %1343 = vmatprep.mubr.f32.mxu0 %v5393_v1  ;;  %1508 = vmatprep.mubr.f32.mxu1 %v5393_v1 }
  0xd3   : > { %1345 = vmatmul.mubr.f32.gmra.mxu0 %v3578_v49  ;;  %1510 = vmatmul.mubr.f32.gmra.mxu1 %v3549_v29 }
  0xd4   : > { %1350 = vmatprep.mubr.f32.mxu0 %v5393_v1  ;;  %1515 = vmatprep.mubr.f32.mxu1 %v5393_v1 }
  0xd7   : > { %1352 = vmatmul.mubr.f32.gmra.mxu0 %v3594_v59  ;;  %1517 = vmatmul.mubr.f32.gmra.mxu1 %v3570_v46 }
  0xd8   : > { %1357 = vmatprep.mubr.f32.mxu0 %v5393_v1  ;;  %1522 = vmatprep.mubr.f32.mxu1 %v5393_v1 }
  0xdb   : > { %1359 = vmatmul.mubr.f32.gmra.mxu0 %v3619_v33  ;;  %1524 = vmatmul.mubr.f32.gmra.mxu1 %v3578_v49 }
  0xdc   : > { %1364 = vmatprep.mubr.f32.mxu0 %v5393_v1  ;;  %1529 = vmatprep.mubr.f32.mxu1 %v5393_v1 }
  0xdf   : > { %1366 = vmatmul.mubr.f32.gmra.mxu0 %v3623_v25  ;;  %1531 = vmatmul.mubr.f32.gmra.mxu1 %v3594_v59 }
  0xe0   : > { %1536 = vmatprep.mubr.f32.mxu1 %v5393_v1  ;;  %1976 = vmatprep.mubr.f32.mxu0 %v5393_v1 }
  0xe3   : > { %v424_v6 = vpop.f32.mrf.mxu0  ;;  %1538 = vmatmul.mubr.f32.gmra.mxu1 %v3619_v33 }
  0xe4   : > { %1543 = vmatprep.mubr.f32.mxu1 %v5393_v1 }
  0xe5   : > { %v426_v9 = vpop.f32.mrf.mxu0 }
  0xe7   : > { %v435_v10 = vpop.f32.mrf.mxu0  ;;  %1545 = vmatmul.mubr.f32.gmra.mxu1 %v3623_v25 }
  0xe8   : > { %2212 = vmatprep.mubr.f32.mxu1 %v5393_v1 }
  0xe9   : > { %v437_v13 = vpop.f32.mrf.mxu0 }
  0xeb   : > { %v446_v14 = vpop.f32.mrf.mxu0  ;;  %v671_v16 = vpop.f32.mrf.mxu1 }
  0xec   : > { %v3815_v17 = vadd.f32 %v671_v16, %v424_v6 }
  0xed   : > { %v448_v18 = vpop.f32.mrf.mxu0  ;;  %v673_v22 = vpop.f32.mrf.mxu1 }
  0xee   : > { %v3817_v27 = vadd.f32 %v673_v22, %v426_v9 }
  0xef   : > { %v457_v28 = vpop.f32.mrf.mxu0  ;;  %v678_v30 = vpop.f32.mrf.mxu1 }
  0xf0   : > { %v3819_v31 = vadd.f32 %v678_v30, %v435_v10 }
  0xf1   : > { %v459_v36 = vpop.f32.mrf.mxu0  ;;  %v680_v39 = vpop.f32.mrf.mxu1 }
  0xf2   : > { %v3821_v40 = vadd.f32 %v680_v39, %v437_v13 }
  0xf3   : > { %v468_v41 = vpop.f32.mrf.mxu0  ;;  %v685_v42 = vpop.f32.mrf.mxu1 }
  0xf4   : > { %v3823_v51 = vadd.f32 %v685_v42, %v446_v14 }
  0xf5   : > { %v470_v52 = vpop.f32.mrf.mxu0  ;;  %v687_v56 = vpop.f32.mrf.mxu1 }
  0xf6   : > { %v3825_v60 = vadd.f32 %v687_v56, %v448_v18 }
  0xf7   : > { %v479_v62 = vpop.f32.mrf.mxu0  ;;  %v692_v63 = vpop.f32.mrf.mxu1 }
  0xf8   : > { %v3827_v4 = vadd.f32 %v692_v63, %v457_v28 }
  0xf9   : > { %v481_v7 = vpop.f32.mrf.mxu0  ;;  %v694_v8 = vpop.f32.mrf.mxu1 }
  0xfa   : > { %v3829_v19 = vadd.f32 %v694_v8, %v459_v36 }
  0xfb   : > { %v490_v21 = vpop.f32.mrf.mxu0  ;;  %v699_v23 = vpop.f32.mrf.mxu1 }
  0xfc   : > { %v3831_v26 = vadd.f32 %v699_v23, %v468_v41 }
  0xfd   : > { %v492_v29 = vpop.f32.mrf.mxu0  ;;  %v701_v34 = vpop.f32.mrf.mxu1 }
  0xfe   : > { %v3833_v38 = vadd.f32 %v701_v34, %v470_v52 }
  0xff   : > { %v501_v43 = vpop.f32.mrf.mxu0  ;;  %v706_v46 = vpop.f32.mrf.mxu1 }
 0x100   : > { %v3835_v49 = vadd.f32 %v706_v46, %v479_v62 }
 0x101   : > { %v503_v55 = vpop.f32.mrf.mxu0  ;;  %v708_v57 = vpop.f32.mrf.mxu1 }
 0x102   : > { %v3837_v59 = vadd.f32 %v708_v57, %v481_v7 }
 0x103   : > { %v512_v2 = vpop.f32.mrf.mxu0  ;;  %v713_v3 = vpop.f32.mrf.mxu1 }
 0x104   : > { %v3839_v5 = vadd.f32 %v713_v3, %v490_v21 }
 0x105   : > { %v514_v12 = vpop.f32.mrf.mxu0  ;;  %v715_v20 = vpop.f32.mrf.mxu1 }
 0x106   : > { %v3841_v24 = vadd.f32 %v715_v20, %v492_v29 }
 0x107   : > { %v523_v32 = vpop.f32.mrf.mxu0  ;;  %v720_v33 = vpop.f32.mrf.mxu1 }
 0x108   : > { %v3843_v25 = vadd.f32 %v720_v33, %v501_v43 }
 0x109   : > { %v525_v35 = vpop.f32.mrf.mxu0  ;;  %v722_v44 = vpop.f32.mrf.mxu1 }
 0x10a   : > { %v3845_v45 = vadd.f32 %v722_v44, %v503_v55 }
 0x10b   : > { %v534_v47 = vpop.f32.mrf.mxu0  ;;  %v727_v37 = vpop.f32.mrf.mxu1 }
 0x10c   : > { %v3847_v50 = vadd.f32 %v727_v37, %v512_v2 }
 0x10d   : > { %v536_v53 = vpop.f32.mrf.mxu0  ;;  %v729_v54 = vpop.f32.mrf.mxu1 }
 0x10e   : > { %v3849_v48 = vadd.f32 %v729_v54, %v514_v12 }
 0x10f   : > { %v545_v61 = vpop.f32.mrf.mxu0  ;;  %v734_v0 = vpop.f32.mrf.mxu1 }
 0x110   : > { %v3851_v11 = vadd.f32 %v734_v0, %v523_v32 }
 0x111   : > { %v547_v58 = vpop.f32.mrf.mxu0  ;;  %v736_v15 = vpop.f32.mrf.mxu1 }
 0x112   : > { %v3853_v6 = vadd.f32 %v736_v15, %v525_v35 }
 0x113   : > { %v556_v9 = vpop.f32.mrf.mxu0  ;;  %v741_v10 = vpop.f32.mrf.mxu1 }
 0x114   : > { %v3855_v13 = vadd.f32 %v741_v10, %v534_v47 }
 0x115   : > { %v558_v14 = vpop.f32.mrf.mxu0  ;;  %v743_v16 = vpop.f32.mrf.mxu1 }
 0x116   : > { %v3857_v18 = vadd.f32 %v743_v16, %v536_v53 }
 0x117   : > { %v567_v22 = vpop.f32.mrf.mxu0  ;;  %v748_v28 = vpop.f32.mrf.mxu1 }
 0x118   : > { %v3859_v30 = vadd.f32 %v748_v28, %v545_v61 }
 0x119   : > { %v569_v36 = vpop.f32.mrf.mxu0  ;;  %v750_v39 = vpop.f32.mrf.mxu1 }
 0x11a   : > { %v3861_v41 = vadd.f32 %v750_v39, %v547_v58 }
 0x11b   : > { %v578_v42 = vpop.f32.mrf.mxu0  ;;  %v755_v52 = vpop.f32.mrf.mxu1 }
 0x11c   : > { %v3863_v56 = vadd.f32 %v755_v52, %v556_v9 }
 0x11d   : > { %v580_v62 = vpop.f32.mrf.mxu0  ;;  %v757_v63 = vpop.f32.mrf.mxu1 }
 0x11e   : > { %v3865_v7 = vadd.f32 %v757_v63, %v558_v14 }
 0x11f   : > { %v589_v8 = vpop.f32.mrf.mxu0  ;;  %v762_v21 = vpop.f32.mrf.mxu1 }
 0x120   : > { %v3867_v23 = vadd.f32 %v762_v21, %v567_v22 }
 0x121   : > { %v591_v29 = vpop.f32.mrf.mxu0  ;;  %v764_v34 = vpop.f32.mrf.mxu1 }
 0x122   : > { %v3869_v43 = vadd.f32 %v764_v34, %v569_v36 }
 0x123   : > { %v769_v46 = vpop.f32.mrf.mxu1  ;;  %v853_v55 = vpop.f32.mrf.mxu0 }
 0x124   : > { %v3871_v57 = vadd.f32 %v769_v46, %v578_v42  ;;  %v854_v2 = vadd.f32 %v853_v55, %v3815_v17 }
 0x125   : > { %v771_v3 = vpop.f32.mrf.mxu1  ;;  %v855_v12 = vpop.f32.mrf.mxu0 }
 0x126   : > { %v3874_v20 = vadd.f32 %v771_v3, %v580_v62  ;;  %v856_v32 = vadd.f32 %v855_v12, %v3817_v27 }
 0x127   : > { %v776_v33 = vpop.f32.mrf.mxu1  ;;  %v861_v35 = vpop.f32.mrf.mxu0 }
 0x128   : > { %v3877_v44 = vadd.f32 %v776_v33, %v589_v8  ;;  %v862_v47 = vadd.f32 %v861_v35, %v3819_v31 }
 0x129   : > { %v778_v37 = vpop.f32.mrf.mxu1  ;;  %v863_v53 = vpop.f32.mrf.mxu0 }
 0x12a   : > { %v3880_v54 = vadd.f32 %v778_v37, %v591_v29  ;;  %v864_v61 = vadd.f32 %v863_v53, %v3821_v40 }
 0x12b   : > { %v869_v0 = vpop.f32.mrf.mxu0  ;;  %v1049_v17 = vpop.f32.mrf.mxu1 }
 0x12c   : > { %v870_v58 = vadd.f32 %v869_v0, %v3823_v51  ;;  %v3884_v15 = vadd.f32 %v1049_v17, %v854_v2 }
 0x12d   : > { %v871_v9 = vpop.f32.mrf.mxu0  ;;  %v1051_v27 = vpop.f32.mrf.mxu1 }
 0x12e   : > { %v872_v10 = vadd.f32 %v871_v9, %v3825_v60  ;;  %v3887_v14 = vadd.f32 %v1051_v27, %v856_v32 }
 0x12f   : > { %v877_v16 = vpop.f32.mrf.mxu0  ;;  %v1058_v31 = vpop.f32.mrf.mxu1 }
 0x130   : > { %v878_v22 = vadd.f32 %v877_v16, %v3827_v4  ;;  %v3890_v28 = vadd.f32 %v1058_v31, %v862_v47 }
 0x131   : > { %v879_v36 = vpop.f32.mrf.mxu0  ;;  %v1060_v40 = vpop.f32.mrf.mxu1 }
 0x132   : > { %v880_v39 = vadd.f32 %v879_v36, %v3829_v19  ;;  %v3893_v42 = vadd.f32 %v1060_v40, %v864_v61 }
 0x133   : > { %v885_v51 = vpop.f32.mrf.mxu0  ;;  %v1067_v52 = vpop.f32.mrf.mxu1 }
 0x134   : > { %v886_v62 = vadd.f32 %v885_v51, %v3831_v26  ;;  %v3896_v63 = vadd.f32 %v1067_v52, %v870_v58 }
 0x135   : > { %v887_v60 = vpop.f32.mrf.mxu0  ;;  %v1069_v8 = vpop.f32.mrf.mxu1 }
 0x136   : > { %v888_v21 = vadd.f32 %v887_v60, %v3833_v38  ;;  %v3899_v29 = vadd.f32 %v1069_v8, %v872_v10 }
 0x137   : > { %v893_v4 = vpop.f32.mrf.mxu0  ;;  %v1076_v34 = vpop.f32.mrf.mxu1 }
 0x138   : > { %v894_v46 = vadd.f32 %v893_v4, %v3835_v49  ;;  %v3902_v55 = vadd.f32 %v1076_v34, %v878_v22 }
 0x139   : > { %v895_v19 = vpop.f32.mrf.mxu0  ;;  %v1078_v2 = vpop.f32.mrf.mxu1 }
 0x13a   : > { %v896_v3 = vadd.f32 %v895_v19, %v3837_v59  ;;  %v3905_v12 = vadd.f32 %v1078_v2, %v880_v39 }
 0x13b   : > { %v901_v26 = vpop.f32.mrf.mxu0  ;;  %v1085_v32 = vpop.f32.mrf.mxu1 }
 0x13c   : > { %v902_v33 = vadd.f32 %v901_v26, %v3839_v5  ;;  %v3908_v35 = vadd.f32 %v1085_v32, %v886_v62 }
 0x13d   : > { %v903_v38 = vpop.f32.mrf.mxu0  ;;  %v1087_v47 = vpop.f32.mrf.mxu1 }
 0x13e   : > { %v904_v37 = vadd.f32 %v903_v38, %v3841_v24  ;;  %v3911_v53 = vadd.f32 %v1087_v47, %v888_v21 }
 0x13f   : > { %v909_v49 = vpop.f32.mrf.mxu0  ;;  %v1094_v61 = vpop.f32.mrf.mxu1 }
 0x140   : > { %v910_v0 = vadd.f32 %v909_v49, %v3843_v25  ;;  %v3914_v17 = vadd.f32 %v1094_v61, %v894_v46 }
 0x141   : > { %v911_v59 = vpop.f32.mrf.mxu0  ;;  %v1096_v58 = vpop.f32.mrf.mxu1 }
 0x142   : > { %v912_v9 = vadd.f32 %v911_v59, %v3845_v45  ;;  %v3917_v27 = vadd.f32 %v1096_v58, %v896_v3 }
 0x143   : > { %v917_v5 = vpop.f32.mrf.mxu0  ;;  %v1103_v10 = vpop.f32.mrf.mxu1 }
 0x144   : > { %v918_v16 = vadd.f32 %v917_v5, %v3847_v50  ;;  %v3920_v31 = vadd.f32 %v1103_v10, %v902_v33 }
 0x145   : > { %v919_v24 = vpop.f32.mrf.mxu0  ;;  %v1105_v22 = vpop.f32.mrf.mxu1 }
 0x146   : > { %v920_v36 = vadd.f32 %v919_v24, %v3849_v48  ;;  %v3923_v40 = vadd.f32 %v1105_v22, %v904_v37 }
 0x147   : > { %v925_v25 = vpop.f32.mrf.mxu0  ;;  %v1112_v39 = vpop.f32.mrf.mxu1 }
 0x148   : > { %v926_v51 = vadd.f32 %v925_v25, %v3851_v11  ;;  %v3926_v52 = vadd.f32 %v1112_v39, %v910_v0 }
 0x149   : > { %v927_v45 = vpop.f32.mrf.mxu0  ;;  %v1114_v62 = vpop.f32.mrf.mxu1 }
 0x14a   : > { %v928_v60 = vadd.f32 %v927_v45, %v3853_v6  ;;  %v3929_v8 = vadd.f32 %v1114_v62, %v912_v9 }
 0x14b   : > { %v933_v50 = vpop.f32.mrf.mxu0  ;;  %v1121_v21 = vpop.f32.mrf.mxu1 }
 0x14c   : > { %v934_v4 = vadd.f32 %v933_v50, %v3855_v13  ;;  %v3932_v34 = vadd.f32 %v1121_v21, %v918_v16 }
 0x14d   : > { %v935_v48 = vpop.f32.mrf.mxu0  ;;  %v1123_v46 = vpop.f32.mrf.mxu1 }
 0x14e   : > { %v936_v19 = vadd.f32 %v935_v48, %v3857_v18  ;;  %v3935_v2 = vadd.f32 %v1123_v46, %v920_v36 }
 0x14f   : > { %v941_v11 = vpop.f32.mrf.mxu0  ;;  %v1130_v3 = vpop.f32.mrf.mxu1 }
 0x150   : > { %v942_v26 = vadd.f32 %v941_v11, %v3859_v30  ;;  %v3938_v32 = vadd.f32 %v1130_v3, %v926_v51 }
 0x151   : > { %v943_v6 = vpop.f32.mrf.mxu0  ;;  %v1132_v33 = vpop.f32.mrf.mxu1 }
 0x152   : > { %v944_v38 = vadd.f32 %v943_v6, %v3861_v41  ;;  %v3941_v47 = vadd.f32 %v1132_v33, %v928_v60 }
 0x153   : > { %v949_v13 = vpop.f32.mrf.mxu0  ;;  %v1139_v37 = vpop.f32.mrf.mxu1 }
 0x154   : > { %v950_v49 = vadd.f32 %v949_v13, %v3863_v56  ;;  %v3944_v61 = vadd.f32 %v1139_v37, %v934_v4 }
 0x155   : > { %v951_v18 = vpop.f32.mrf.mxu0  ;;  %v1141_v0 = vpop.f32.mrf.mxu1 }
 0x156   : > { %v952_v59 = vadd.f32 %v951_v18, %v3865_v7  ;;  %v3947_v58 = vadd.f32 %v1141_v0, %v936_v19 }
 0x157   : > { %v957_v30 = vpop.f32.mrf.mxu0  ;;  %v1148_v9 = vpop.f32.mrf.mxu1 }
 0x158   : > { %v958_v5 = vadd.f32 %v957_v30, %v3867_v23  ;;  %v3950_v10 = vadd.f32 %v1148_v9, %v942_v26 }
 0x159   : > { %v959_v41 = vpop.f32.mrf.mxu0  ;;  %v1150_v16 = vpop.f32.mrf.mxu1 }
 0x15a   : > { %v960_v24 = vadd.f32 %v959_v41, %v3869_v43  ;;  %v3953_v22 = vadd.f32 %v1150_v16, %v944_v38 }
 0x15b   : > { %v965_v56 = vpop.f32.mrf.mxu0  ;;  %v1157_v36 = vpop.f32.mrf.mxu1 }
 0x15c   : > { %v966_v25 = vadd.f32 %v965_v56, %v3871_v57  ;;  %v3956_v39 = vadd.f32 %v1157_v36, %v950_v49 }
 0x15d   : > { %v967_v7 = vpop.f32.mrf.mxu0  ;;  %v1159_v51 = vpop.f32.mrf.mxu1 }
 0x15e   : > { %v968_v45 = vadd.f32 %v967_v7, %v3874_v20  ;;  %v3959_v62 = vadd.f32 %v1159_v51, %v952_v59 }
 0x15f   : > { %v3961_v23 = vpop.f32.mrf.mxu0  ;;  %v1166_v60 = vpop.f32.mrf.mxu1 }
 0x160   : > { %v3963_v50 = vadd.f32 %v1166_v60, %v958_v5 }
 0x161   : > { %v3965_v43 = vpop.f32.mrf.mxu0  ;;  %v1168_v21 = vpop.f32.mrf.mxu1 }
 0x162   : > { %v3967_v4 = vadd.f32 %v1168_v21, %v960_v24 }
 0x163   : > { %v1175_v48 = vpop.f32.mrf.mxu1  ;;  %v1262_v57 = vpop.f32.mrf.mxu0 }
 0x164   : > { %v3969_v46 = vadd.f32 %v1175_v48, %v966_v25  ;;  %v1263_v9 = vadd.f32 %v1262_v57, %v3884_v15 }
 0x165   : > { %v1177_v19 = vpop.f32.mrf.mxu1  ;;  %v1264_v11 = vpop.f32.mrf.mxu0 }
 0x166   : > { %v3971_v3 = vadd.f32 %v1177_v19, %v968_v45  ;;  %v1265_v24 = vadd.f32 %v1264_v11, %v3887_v14 }
 0x167   : > { %v3973_v20 = vpop.f32.mrf.mxu1  ;;  %v1269_v26 = vpop.f32.mrf.mxu0 }
 0x168   : > { %v1270_v7 = vadd.f32 %v1269_v26, %v3890_v28 }
 0x169   : > { %v3975_v6 = vpop.f32.mrf.mxu1  ;;  %v1271_v33 = vpop.f32.mrf.mxu0 }
 0x16a   : > { %v1272_v14 = vadd.f32 %v1271_v33, %v3893_v42 }
 0x16b   : > { %v1276_v38 = vpop.f32.mrf.mxu0  ;;  %v1441_v13 = vpop.f32.mrf.mxu1 }
 0x16c   : > { %v1277_v5 = vadd.f32 %v1276_v38, %v3896_v63  ;;  %v3980_v56 = vadd.f32 %v1441_v13, %v1263_v9 }
 0x16d   : > { %v1278_v37 = vpop.f32.mrf.mxu0  ;;  %v1443_v49 = vpop.f32.mrf.mxu1 }
 0x16e   : > { %v1279_v36 = vadd.f32 %v1278_v37, %v3899_v29  ;;  %v3986_v60 = vadd.f32 %v1443_v49, %v1265_v24 }
 0x16f   : > { %v1283_v18 = vpop.f32.mrf.mxu0  ;;  %v1448_v0 = vpop.f32.mrf.mxu1 }
 0x170   : > { %v1284_v15 = vadd.f32 %v1283_v18, %v3902_v55  ;;  %v3994_v29 = vadd.f32 %v1448_v0, %v1270_v7 }
 0x171   : > { %v1285_v59 = vpop.f32.mrf.mxu0  ;;  %v1450_v30 = vpop.f32.mrf.mxu1 }
 0x172   : > { %v1286_v19 = vadd.f32 %v1285_v59, %v3905_v12  ;;  %v4001_v38 = vadd.f32 %v1450_v30, %v1272_v14 }
 0x173   : > { %v1290_v41 = vpop.f32.mrf.mxu0  ;;  %v1455_v16 = vpop.f32.mrf.mxu1 }
 0x174   : > { %v3983_v25 = vadd.f32 %v1455_v16, %v1277_v5  ;;  %v1291_v13 = vadd.f32 %v1290_v41, %v3908_v35 }
 0x175   : > { %v1292_v51 = vpop.f32.mrf.mxu0  ;;  %v1457_v45 = vpop.f32.mrf.mxu1 }
 0x176   : > { %v1551_v63 = vmin.f32 %v3980_v56, %v3983_v25  ;;  %v3991_v21 = vadd.f32 %v1457_v45, %v1279_v36  ;;  %v1293_v12 = vadd.f32 %v1292_v51, %v3911_v53 }
 0x177   : > { %v1297_v48 = vpop.f32.mrf.mxu0  ;;  %v1462_v57 = vpop.f32.mrf.mxu1 }
 0x178   : > { %v1572_v28 = vmin.f32 %v3986_v60, %v3991_v21  ;;  %v3999_v11 = vadd.f32 %v1462_v57, %v1284_v15  ;;  %v1298_v30 = vadd.f32 %v1297_v48, %v3914_v17 }
 0x179   : > { %v1299_v26 = vpop.f32.mrf.mxu0  ;;  %v1464_v55 = vpop.f32.mrf.mxu1 }
 0x17a   : > { %v1552_v42 = vmin.f32 %v3994_v29, %v3999_v11  ;;  %v4006_v33 = vadd.f32 %v1464_v55, %v1286_v19  ;;  %v1300_v24 = vadd.f32 %v1299_v26, %v3917_v27 }
 0x17b   : > { %v1304_v37 = vpop.f32.mrf.mxu0  ;;  %v1469_v49 = vpop.f32.mrf.mxu1 }
 0x17c   : > { %v1573_v18 = vmin.f32 %v4001_v38, %v4006_v33  ;;  %v4011_v0 = vadd.f32 %v1469_v49, %v1291_v13  ;;  %v1305_v45 = vadd.f32 %v1304_v37, %v3920_v31 }
 0x17d   : > { %v1306_v59 = vpop.f32.mrf.mxu0  ;;  %v1471_v9 = vpop.f32.mrf.mxu1 }
 0x17e   : > { %v1553_v35 = vmin.f32 %v1551_v63, %v4011_v0  ;;  %v4015_v5 = vadd.f32 %v1471_v9, %v1293_v12  ;;  %v1307_v48 = vadd.f32 %v1306_v59, %v3923_v40 }
 0x17f   : > { %v1311_v41 = vpop.f32.mrf.mxu0  ;;  %v1476_v16 = vpop.f32.mrf.mxu1 }
 0x180   : > { %v1574_v36 = vmin.f32 %v1572_v28, %v4015_v5  ;;  %v4019_v53 = vadd.f32 %v1476_v16, %v1298_v30  ;;  %v1312_v26 = vadd.f32 %v1311_v41, %v3926_v52 }
 0x181   : > { %v1313_v7 = vpop.f32.mrf.mxu0  ;;  %v1478_v51 = vpop.f32.mrf.mxu1 }
 0x182   : > { %v1554_v15 = vmin.f32 %v1552_v42, %v4019_v53  ;;  %v4023_v14 = vadd.f32 %v1478_v51, %v1300_v24  ;;  %v1314_v37 = vadd.f32 %v1313_v7, %v3929_v8 }
 0x183   : > { %v1318_v17 = vpop.f32.mrf.mxu0  ;;  %v1483_v63 = vpop.f32.mrf.mxu1 }
 0x184   : > { %v1575_v57 = vmin.f32 %v1573_v18, %v4023_v14  ;;  %v4027_v19 = vadd.f32 %v1483_v63, %v1305_v45  ;;  %v1319_v59 = vadd.f32 %v1318_v17, %v3932_v34 }
 0x185   : > { %v1320_v27 = vpop.f32.mrf.mxu0  ;;  %v1485_v28 = vpop.f32.mrf.mxu1 }
 0x186   : > { %v1555_v55 = vmin.f32 %v1553_v35, %v4027_v19  ;;  %v4031_v13 = vadd.f32 %v1485_v28, %v1307_v48  ;;  %v1321_v41 = vadd.f32 %v1320_v27, %v3935_v2 }
 0x187   : > { %v1325_v31 = vpop.f32.mrf.mxu0  ;;  %v1490_v42 = vpop.f32.mrf.mxu1 }
 0x188   : > { %v1576_v49 = vmin.f32 %v1574_v36, %v4031_v13  ;;  %v4035_v12 = vadd.f32 %v1490_v42, %v1312_v26  ;;  %v1326_v7 = vadd.f32 %v1325_v31, %v3938_v32 }
 0x189   : > { %v1327_v40 = vpop.f32.mrf.mxu0  ;;  %v1492_v18 = vpop.f32.mrf.mxu1 }
 0x18a   : > { %v1556_v9 = vmin.f32 %v1554_v15, %v4035_v12  ;;  %v4039_v30 = vadd.f32 %v1492_v18, %v1314_v37  ;;  %v1328_v17 = vadd.f32 %v1327_v40, %v3941_v47 }
 0x18b   : > { %v1332_v52 = vpop.f32.mrf.mxu0  ;;  %v1497_v35 = vpop.f32.mrf.mxu1 }
 0x18c   : > { %v1577_v16 = vmin.f32 %v1575_v57, %v4039_v30  ;;  %v4043_v24 = vadd.f32 %v1497_v35, %v1319_v59  ;;  %v1333_v27 = vadd.f32 %v1332_v52, %v3944_v61 }
 0x18d   : > { %v1334_v8 = vpop.f32.mrf.mxu0  ;;  %v1499_v36 = vpop.f32.mrf.mxu1 }
 0x18e   : > { %v1557_v51 = vmin.f32 %v1555_v55, %v4043_v24  ;;  %v4047_v45 = vadd.f32 %v1499_v36, %v1321_v41  ;;  %v1335_v31 = vadd.f32 %v1334_v8, %v3947_v58 }
 0x18f   : > { %v1339_v34 = vpop.f32.mrf.mxu0  ;;  %v1504_v15 = vpop.f32.mrf.mxu1 }
 0x190   : > { %v1578_v63 = vmin.f32 %v1576_v49, %v4047_v45  ;;  %v4051_v48 = vadd.f32 %v1504_v15, %v1326_v7  ;;  %v1340_v40 = vadd.f32 %v1339_v34, %v3950_v10 }
 0x191   : > { %v1341_v2 = vpop.f32.mrf.mxu0  ;;  %v1506_v57 = vpop.f32.mrf.mxu1 }
 0x192   : > { %v1558_v28 = vmin.f32 %v1556_v9, %v4051_v48  ;;  %v4055_v26 = vadd.f32 %v1506_v57, %v1328_v17  ;;  %v1342_v52 = vadd.f32 %v1341_v2, %v3953_v22 }
 0x193   : > { %v1346_v32 = vpop.f32.mrf.mxu0  ;;  %v1511_v55 = vpop.f32.mrf.mxu1 }
 0x194   : > { %v1579_v42 = vmin.f32 %v1577_v16, %v4055_v26  ;;  %v4059_v37 = vadd.f32 %v1511_v55, %v1333_v27  ;;  %v1347_v8 = vadd.f32 %v1346_v32, %v3956_v39 }
 0x195   : > { %v1348_v47 = vpop.f32.mrf.mxu0  ;;  %v1513_v49 = vpop.f32.mrf.mxu1 }
 0x196   : > { %v1559_v18 = vmin.f32 %v1557_v51, %v4059_v37  ;;  %v4063_v59 = vadd.f32 %v1513_v49, %v1335_v31  ;;  %v1349_v34 = vadd.f32 %v1348_v47, %v3959_v62  ;;  %v3208_v62 = vld [vmem:[%s3413_s24] sm:$0xff]  ;;  %v974_v49 = vadd.f32 %v3961_v23, %v3877_v44  ;;  %s3012_s24 = sshll.u32 %s3388_s11, 1 }
 0x197   : > { %v1353_v61 = vpop.f32.mrf.mxu0  ;;  %v1518_v9 = vpop.f32.mrf.mxu1  ;;  %v2774_v31 = vmul.f32 %v3208_v62, %v3208_v62  ;;  %s270_s22 = scalar_lea.vmem %s5391_s4, %s3012_s24  ;;  %s3290_s24 = smov [#allocation2]  }
 0x198   : > { %v1580_v35 = vmin.f32 %v1578_v63, %v4063_v59  ;;  %v4067_v41 = vadd.f32 %v1518_v9, %v1340_v40  ;;  %v1354_v2 = vadd.f32 %v1353_v61, %v3963_v50  ;;  %v1185_v9 = vadd.f32 %v3973_v20, %v974_v49  ;;  %s3213_s13 = sshll.u32 %s3290_s24, 4  ;;  %s3214_s13 = int_to_ptr.vmem [resolvable:$false] %s3213_s13 }
 0x199   : > { %v1355_v58 = vpop.f32.mrf.mxu0  ;;  %v1520_v16 = vpop.f32.mrf.mxu1  ;;  %v2778_v23 = vsel %vm276_vm1, %v2774_v31, 0.0  ;;  %s3215_s21 = scalar_lea.vmem %s3214_s13, 64  ;;  %p3216_p1 = scmp.lt.s32.totalorder %s2854_s8, %s3214_s13 }
 0x19a   : > { %v1560_v36 = vmin.f32 %v1558_v28, %v4067_v41  ;;  %v4071_v10 = vadd.f32 %v1520_v16, %v1342_v52  ;;  %v1356_v28 = vadd.f32 %v1355_v58, %v3967_v4  ;;  %v976_v4 = vadd.f32 %v3965_v43, %v3880_v54  ;;  %p3217_p2 = scmp.lt.s32.totalorder %s3215_s21, %s3209_s10 }
 0x19b   : > { %v1360_v7 = vpop.f32.mrf.mxu0  ;;  %v1525_v51 = vpop.f32.mrf.mxu1 }
 0x19c   : > { %v1581_v15 = vmin.f32 %v1579_v42, %v4071_v10  ;;  %v4075_v22 = vadd.f32 %v1525_v51, %v1347_v8  ;;  %v1361_v50 = vadd.f32 %v1360_v7, %v3969_v46  ;;  %v2776_v46 = vcombine.high %v2774_v31, %v2774_v31  ;;  %p3218_p3 = por %p3217_p2, %p3216_p1 }
 0x19d   : > { %v1362_v17 = vpop.f32.mrf.mxu0  ;;  %v1527_v63 = vpop.f32.mrf.mxu1  ;;  %v1187_v8 = vadd.f32 %v3975_v6, %v976_v4 }
 0x19e   : > { %v1561_v57 = vmin.f32 %v1559_v18, %v4075_v22  ;;  %v4079_v39 = vadd.f32 %v1527_v63, %v1349_v34  ;;  %v1363_v52 = vadd.f32 %v1362_v17, %v3971_v3  ;;  %v2779_v34 = vrot.slane %v2778_v23, 4  ;;  %p3219_p5 = pnand %p3218_p3, %p3212_p0 }
 0x19f   : > { %v1532_v27 = vpop.f32.mrf.mxu1  ;;  %v1367_v42 = vpop.f32.mrf.mxu0  ;;  %v5392_v63 = vlaneseq  ;;  %v2785_v6 = vsel %vm276_vm1, %v2776_v46, 0.0 }
 0x1a0   : > { %v1582_v32 = vmin.f32 %v1580_v35, %v4079_v39  ;;  %v4083_v55 = vadd.f32 %v1532_v27, %v1354_v2  ;;  %v2786_v62 = vrot.slane %v2785_v6, 4 }
 0x1a1   : > { %v1534_v47 = vpop.f32.mrf.mxu1  ;;  %v1369_v16 = vpop.f32.mrf.mxu0 }
 0x1a2   : > { %v1562_v40 = vmin.f32 %v1560_v36, %v4083_v55  ;;  %v4090_v18 = vadd.f32 %v1534_v47, %v1356_v28  ;;  %v1368_v36 = vadd.f32 %v1367_v42, %v1185_v9  ;;  %v1370_v20 = vadd.f32 %v1369_v16, %v1187_v8  ;;  %v1864_v47 = vpop.trf.xlu0 }
 0x1a3   : > { %v1539_v61 = vpop.f32.mrf.mxu1  ;;  %v2780_v28 = vadd.f32 %v2779_v34, %v2778_v23  ;;  %v4113_v42 = vshrl.u32 %v5392_v63, 7 }
 0x1a4   : > { %v1583_v35 = vmin.f32 %v1581_v15, %v4090_v18  ;;  %v4097_v58 = vadd.f32 %v1539_v61, %v1361_v50  ;;  %v2787_v61 = vadd.f32 %v2786_v62, %v2785_v6 }
 0x1a5   : > { %v1541_v44 = vpop.f32.mrf.mxu1  ;;  %v2781_v4 = vrot.slane %v2780_v28, 2  ;;  %v4127_v23 = vadd.s32 32, %v4113_v42  ;;  %v4130_v46 = vadd.s32 40, %v4113_v42  ;;  %v4145_v6 = vadd.s32 72, %v4113_v42 }
 0x1a6   : > { %v1563_v7 = vmin.f32 %v1561_v57, %v4097_v58  ;;  %v4102_v54 = vadd.f32 %v1541_v44, %v1363_v52  ;;  %v4118_v52 = vadd.s32 8, %v4113_v42  ;;  %v4124_v44 = vadd.s32 24, %v4113_v42 }
 0x1a7   : > { %v1546_v43 = vpop.f32.mrf.mxu1  ;;  %5461 = vst [vmem:[#allocation7_spill] sm:$0xff] %v4127_v23  ;;  %5462 = vst [vmem:[#allocation8_spill] sm:$0xff] %v4130_v46  ;;  %v4157_v62 = vadd.s32 104, %v4113_v42 }
 0x1a8   : > { %v1584_v3 = vmin.f32 %v1582_v32, %v4102_v54  ;;  %v4105_v51 = vadd.f32 %v1546_v43, %v1368_v36  ;;  %5459 = vst [vmem:[#allocation5_spill] sm:$0xff] %v4118_v52  ;;  %5460 = vst [vmem:[#allocation6_spill] sm:$0xff] %v4124_v44  ;;  %v4133_v36 = vadd.s32 48, %v4113_v42  ;;  %v2782_v43 = vadd.f32 %v2781_v4, %v2780_v28 }
 0x1a9   : > { %v1548_v15 = vpop.f32.mrf.mxu1  ;;  %5465 = vst [vmem:[#allocation11_spill] sm:$0xff] %v4145_v6  ;;  %v4154_v28 = vadd.s32 96, %v4113_v42 }
 0x1aa   : > { %v1564_v17 = vmin.f32 %v1562_v40, %v4105_v51  ;;  %v4108_v2 = vadd.f32 %v1548_v15, %v1370_v20  ;;  %v4115_v40 = vand.u32 4294901760, %v1864_v47  ;;  %v4139_v20 = vadd.s32 64, %v4113_v42 }
 0x1ab   : > { %v2788_v15 = vrot.slane %v2787_v61, 2 }
 0x1ac   : > { %v1565_v27 = vmin.f32 %v1563_v7, %v1564_v17  ;;  %v1585_v57 = vmin.f32 %v1583_v35, %v4108_v2  ;;  %v4121_v35 = vadd.s32 16, %v4113_v42  ;;  %v4136_v7 = vadd.s32 56, %v4113_v42 }
 0x1ad   : > { %v4142_v34 = vsub.f32 %v1864_v47, %v4115_v40  ;;  %v4165_v47 = vadd.s32 120, %v4113_v42  ;;  %v4170_v1 = vadd.f32 %v2788_v15, %v2787_v61 }
 0x1ae   : > { %v1566_v31 = vrot.slane %v1565_v27, 4  ;;  %v1586_v32 = vmin.f32 %v1584_v3, %v1585_v57  ;;  %5463 = vst [vmem:[#allocation9_spill] sm:$0xff] %v4136_v7  ;;  %v4151_v57 = vadd.s32 88, %v4113_v42 }
 0x1af   : > { %5464 = vst [vmem:[#allocation10_spill] sm:$0xff] %v4142_v34  ;;  %v5395_v4 = vand.u32 4294901760, %v4142_v34 }
 0x1b0   : > { %v1567_v49 = vmin.f32 %v1565_v27, %v1566_v31  ;;  %v1587_v50 = vrot.slane %v1586_v32, 4  ;;  %v4148_v27 = vadd.s32 80, %v4113_v42  ;;  %v4160_v31 = vadd.s32 112, %v4113_v42 }
 0x1b2   : > { %v1568_v9 = vrot.slane %v1567_v49, 2  ;;  %v1588_v16 = vmin.f32 %v1586_v32, %v1587_v50 }
 0x1b4   : > { %v1569_v8 = vmin.f32 %v1567_v49, %v1568_v9  ;;  %v1589_v3 = vrot.slane %v1588_v16, 2  ;;  %v2783_v49 = vrot.slane %v2782_v43, 1  ;;  %v3288_v9 = vmov 1966171168  }
 0x1b5   : > { %v4168_v63 = vunpack.c.l.s4 %v3288_v9 }
 0x1b6   : > { %v1570_v17 = vrot.slane %v1569_v8, 1  ;;  %v1590_v50 = vmin.f32 %v1588_v16, %v1589_v3  ;;  %v4204_v16 = vadd.f32 %v2783_v49, %v2782_v43  ;;  %v2790_v3 = vrot.slane %v4170_v1, 1 }
 0x1b8   : > { %v4162_v32 = vmin.f32 %v1569_v8, %v1570_v17  ;;  %v1591_v61 = vrot.slane %v1590_v50, 1 }
 0x1ba   : > { %vm1610_vm3 = vcmp.eq.f32.partialorder %v3980_v56, %v4162_v32  ;;  %vm1612_vm4 = vcmp.eq.f32.partialorder %v3994_v29, %v4162_v32  ;;  %vm1614_vm5 = vcmp.eq.f32.partialorder %v3983_v25, %v4162_v32  ;;  %vm1616_vm6 = vcmp.eq.f32.partialorder %v3999_v11, %v4162_v32 }
 0x1bb   : > { %vm1618_vm7 = vcmp.eq.f32.partialorder %v4011_v0, %v4162_v32  ;;  %vm1620_vm8 = vcmp.eq.f32.partialorder %v4019_v53, %v4162_v32  ;;  %vm1622_vm9 = vcmp.eq.f32.partialorder %v4027_v19, %v4162_v32  ;;  %vm1624_vm10 = vcmp.eq.f32.partialorder %v4035_v12, %v4162_v32 }
 0x1bc   : > { %vm1626_vm11 = vcmp.eq.f32.partialorder %v4043_v24, %v4162_v32  ;;  %vm1628_vm12 = vcmp.eq.f32.partialorder %v4051_v48, %v4162_v32  ;;  %vm1630_vm13 = vcmp.eq.f32.partialorder %v4059_v37, %v4162_v32  ;;  %vm1632_vm14 = vcmp.eq.f32.partialorder %v4067_v41, %v4162_v32 }
 0x1bd   : > { %vm1634_vm15 = vcmp.eq.f32.partialorder %v4075_v22, %v4162_v32  ;;  %vm1636_vm0 = vcmp.eq.f32.partialorder %v4083_v55, %v4162_v32  ;;  %vm1638_vm1 = vcmp.eq.f32.partialorder %v4097_v58, %v4162_v32  ;;  %vm1640_vm2 = vcmp.eq.f32.partialorder %v4105_v51, %v4162_v32 }
 0x1be   : > { %v1642_v15 = vsel %vm1610_vm3, %v4113_v42, 128  ;;  %v1644_v17 = vsel %vm1612_vm4, %v4118_v52, 128  ;;  %v1646_v43 = vsel %vm1614_vm5, %v4121_v35, 128  ;;  %v1648_v49 = vsel %vm1616_vm6, %v4124_v44, 128 }
 0x1bf   : > { %v1650_v56 = vsel %vm1618_vm7, %v4127_v23, 128  ;;  %v1652_v29 = vsel %vm1620_vm8, %v4130_v46, 128  ;;  %v1654_v25 = vsel %vm1622_vm9, %v4133_v36, 128  ;;  %v4239_v11 = vsub.f32 %v4142_v34, %v5395_v4 }
 0x1c0   : > { %v1656_v0 = vsel %vm1624_vm10, %v4136_v7, 128  ;;  %v1658_v53 = vsel %vm1626_vm11, %v4139_v20, 128  ;;  %v1660_v19 = vsel %vm1628_vm12, %v4145_v6, 128  ;;  %v1662_v9 = vsel %vm1630_vm13, %v4148_v27, 128 }
 0x1c1   : > { %v1664_v12 = vsel %vm1632_vm14, %v4151_v57, 128  ;;  %vm1674_vm3 = vcmp.lt.s32.totalorder %v1642_v15, %v1646_v43  ;;  %vm1676_vm4 = vcmp.lt.s32.totalorder %v1644_v17, %v1648_v49  ;;  %v4261_v4 = vmin.f32 %v1590_v50, %v1591_v61 }
 0x1c2   : > { %v1666_v24 = vsel %vm1634_vm15, %v4154_v28, 128  ;;  %v1668_v48 = vsel %vm1636_vm0, %v4157_v62, 128  ;;  %v1675_v37 = vsel %vm1674_vm3, %v1642_v15, %v1646_v43  ;;  %v1677_v8 = vsel %vm1676_vm4, %v1644_v17, %v1648_v49 }
 0x1c3   : > { %5466 = vst [vmem:[#allocation12_spill] sm:$0xff] %v4261_v4  ;;  %vm1678_vm5 = vcmp.lt.s32.totalorder %v1675_v37, %v1650_v56  ;;  %vm1680_vm6 = vcmp.lt.s32.totalorder %v1677_v8, %v1652_v29  ;;  %vm1611_vm7 = vcmp.eq.f32.partialorder %v3986_v60, %v4261_v4  ;;  %vm1613_vm8 = vcmp.eq.f32.partialorder %v4001_v38, %v4261_v4 }
 0x1c4   : > { %v1679_v41 = vsel %vm1678_vm5, %v1675_v37, %v1650_v56  ;;  %v1681_v50 = vsel %vm1680_vm6, %v1677_v8, %v1652_v29  ;;  %vm1615_vm9 = vcmp.eq.f32.partialorder %v3991_v21, %v4261_v4  ;;  %vm1617_vm10 = vcmp.eq.f32.partialorder %v4006_v33, %v4261_v4 }
 0x1c5   : > { %vm1682_vm11 = vcmp.lt.s32.totalorder %v1679_v41, %v1654_v25  ;;  %vm1684_vm12 = vcmp.lt.s32.totalorder %v1681_v50, %v1656_v0  ;;  %vm1627_vm5 = vcmp.eq.f32.partialorder %v4047_v45, %v4261_v4  ;;  %vm1629_vm6 = vcmp.eq.f32.partialorder %v4055_v26, %v4261_v4 }
 0x1c6   : > { %v1683_v22 = vsel %vm1682_vm11, %v1679_v41, %v1654_v25  ;;  %v1685_v55 = vsel %vm1684_vm12, %v1681_v50, %v1656_v0  ;;  %vm1635_vm0 = vcmp.eq.f32.partialorder %v4079_v39, %v4261_v4  ;;  %vm1637_vm13 = vcmp.eq.f32.partialorder %v4090_v18, %v4261_v4 }
 0x1c7   : > { %vm1686_vm3 = vcmp.lt.s32.totalorder %v1683_v22, %v1658_v53  ;;  %vm1688_vm4 = vcmp.lt.s32.totalorder %v1685_v55, %v1660_v19  ;;  %v1670_v43 = vsel %vm1638_vm1, %v4160_v31, 128  ;;  %v2791_v49 = vadd.f32 %v2790_v3, %v4170_v1 }
 0x1c8   : > { %v1687_v61 = vsel %vm1686_vm3, %v1683_v22, %v1658_v53  ;;  %v1689_v8 = vsel %vm1688_vm4, %v1685_v55, %v1660_v19  ;;  %vm1639_vm3 = vcmp.eq.f32.partialorder %v4102_v54, %v4261_v4  ;;  %v1672_v56 = vsel %vm1640_vm2, %v4165_v47, 128 }
 0x1c9   : > { %vm1690_vm15 = vcmp.lt.s32.totalorder %v1687_v61, %v1662_v9  ;;  %vm1692_vm14 = vcmp.lt.s32.totalorder %v1689_v8, %v1664_v12  ;;  %v5467_v58 = vunpack.c.0.s8 %v4168_v63  ;;  %v1643_v51 = vsel %vm1611_vm7, %v4113_v42, 128 }
 0x1ca   : > { %v1691_v15 = vsel %vm1690_vm15, %v1687_v61, %v1662_v9  ;;  %v1693_v17 = vsel %vm1692_vm14, %v1689_v8, %v1664_v12  ;;  %vm5397_vm14 = vcmp.lt.f32.partialorder %v4162_v32, inf  ;;  %v1647_v3 = vsel %vm1615_vm9, %v4121_v35, 128 }
 0x1cb   : > { %vm1694_vm12 = vcmp.lt.s32.totalorder %v1691_v15, %v1666_v24  ;;  %vm1696_vm11 = vcmp.lt.s32.totalorder %v1693_v17, %v1668_v48  ;;  %v4317_v53 = vsub.s32 %v5467_v58, %v4113_v42  ;;  %v1645_v63 = vsel %vm1613_vm8, %v4118_v52, 128 }
 0x1cc   : > { %v1695_v29 = vsel %vm1694_vm12, %v1691_v15, %v1666_v24  ;;  %v1697_v25 = vsel %vm1696_vm11, %v1693_v17, %v1668_v48  ;;  %v1649_v9 = vsel %vm1617_vm10, %v4124_v44, 128  ;;  %v2737_v60 = vsel %vm5397_vm14, %v4162_v32, inf }
 0x1cd   : > { %vm1698_vm15 = vcmp.lt.s32.totalorder %v1695_v29, %v1670_v43  ;;  %vm1700_vm4 = vcmp.lt.s32.totalorder %v1697_v25, %v1672_v56  ;;  %vm5468_vm2 = vcmp.eq.f32.partialorder %v4015_v5, %v4261_v4  ;;  %vm5469_vm7 = vcmp.eq.f32.partialorder %v4023_v14, %v4261_v4 }
 0x1ce   : > { %v1699_v19 = vsel %vm1698_vm15, %v1695_v29, %v1670_v43  ;;  %v1701_v1 = vsel %vm1700_vm4, %v1697_v25, %v1672_v56  ;;  %v1651_v21 = vsel %vm5468_vm2, %v4127_v23, 128  ;;  %v1653_v38 = vsel %vm5469_vm7, %v4130_v46, 128 }
 0x1cf   : > { %vm1702_vm1 = vcmp.lt.s32.totalorder %v1699_v19, %v1701_v1  ;;  %vm5470_vm8 = vcmp.eq.f32.partialorder %v4031_v13, %v4261_v4  ;;  %vm5471_vm9 = vcmp.eq.f32.partialorder %v4039_v30, %v4261_v4  ;;  %v1659_v5 = vsel %vm1627_vm5, %v4139_v20, 128 }
 0x1d0   : > { %v1703_v12 = vsel %vm1702_vm1, %v1699_v19, %v1701_v1  ;;  %v1655_v33 = vsel %vm5470_vm8, %v4133_v36, 128  ;;  %v1657_v48 = vsel %vm5471_vm9, %v4136_v7, 128  ;;  %vm1713_vm10 = vcmp.lt.s32.totalorder %v1643_v51, %v1647_v3 }
 0x1d1   : > { %v1704_v24 = vrot.slane %v1703_v12, 4  ;;  %v1714_v37 = vsel %vm1713_vm10, %v1643_v51, %v1647_v3  ;;  %vm1715_vm11 = vcmp.lt.s32.totalorder %v1645_v63, %v1649_v9  ;;  %v2792_v14 = vadd.f32 %v4204_v16, %v2737_v60 }
 0x1d2   : > { %vm5396_vm12 = vcmp.lt.f32.partialorder %v4261_v4, inf  ;;  %v1716_v13 = vsel %vm1715_vm11, %v1645_v63, %v1649_v9  ;;  %vm1717_vm15 = vcmp.lt.s32.totalorder %v1714_v37, %v1651_v21  ;;  %v1661_v45 = vsel %vm1629_vm6, %v4145_v6, 128 }
 0x1d3   : > { %vm1705_vm4 = vcmp.lt.s32.totalorder %v1703_v12, %v1704_v24  ;;  %v2738_v30 = vsel %vm5396_vm12, %v4261_v4, inf  ;;  %v1718_v50 = vsel %vm1717_vm15, %v1714_v37, %v1651_v21  ;;  %vm1719_vm5 = vcmp.lt.s32.totalorder %v1716_v13, %v1653_v38 }
 0x1d4   : > { %v1706_v41 = vsel %vm1705_vm4, %v1703_v12, %v1704_v24  ;;  %v1720_v55 = vsel %vm1719_vm5, %v1716_v13, %v1653_v38  ;;  %vm1721_vm1 = vcmp.lt.s32.totalorder %v1718_v50, %v1655_v33  ;;  %v2793_v16 = vadd.f32 %v2791_v49, %v2738_v30 }
 0x1d5   : > { %v1707_v22 = vrot.slane %v1706_v41, 2  ;;  %vm5472_vm2 = vcmp.eq.f32.partialorder %v4063_v59, %v4261_v4  ;;  %v1722_v8 = vsel %vm1721_vm1, %v1718_v50, %v1655_v33  ;;  %vm1723_vm7 = vcmp.lt.s32.totalorder %v1720_v55, %v1657_v48 }
 0x1d6   : > { %v1663_v61 = vsel %vm5472_vm2, %v4148_v27, 128  ;;  %v2794_v15 = vmax.f32 %v2792_v14, 0.0  ;;  %v1724_v17 = vsel %vm1723_vm7, %v1720_v55, %v1657_v48  ;;  %vm1725_vm9 = vcmp.lt.s32.totalorder %v1722_v8, %v1659_v5 }
 0x1d7   : > { %vm1708_vm8 = vcmp.lt.s32.totalorder %v1706_v41, %v1707_v22  ;;  %v2795_v43 = vmax.f32 %v2793_v16, 0.0  ;;  %vm5473_vm6 = vcmp.eq.f32.partialorder %v4071_v10, %v4261_v4  ;;  %v1726_v29 = vsel %vm1725_vm9, %v1722_v8, %v1659_v5 }
 0x1d8   : > { %v1709_v26 = vsel %vm1708_vm8, %v1706_v41, %v1707_v22  ;;  %v1665_v56 = vsel %vm5473_vm6, %v4151_v57, 128  ;;  %vm1727_vm10 = vcmp.lt.s32.totalorder %v1724_v17, %v1661_v45  ;;  %vm1729_vm11 = vcmp.lt.s32.totalorder %v1726_v29, %v1663_v61 }
 0x1d9   : > { %v1710_v49 = vrot.slane %v1709_v26, 1  ;;  %v1728_v25 = vsel %vm1727_vm10, %v1724_v17, %v1661_v45  ;;  %v4375_v59 = vcombine.low %v2794_v15, %v2795_v43  ;;  %v1667_v58 = vsel %vm1635_vm0, %v4154_v28, 128 }
 0x1da   : > { %v1669_v19 = vsel %vm1637_vm13, %v4157_v62, 128  ;;  %v1730_v1 = vsel %vm1729_vm11, %v1726_v29, %v1663_v61  ;;  %vm1731_vm4 = vcmp.lt.s32.totalorder %v1728_v25, %v1665_v56  ;;  %v1671_v10 = vsel %vm1639_vm3, %v4160_v31, 128 }
 0x1db   : > { %vm1711_vm15 = vcmp.lt.s32.totalorder %v1709_v26, %v1710_v49  ;;  %v1732_v51 = vsel %vm1731_vm4, %v1728_v25, %v1665_v56  ;;  %vm1733_vm5 = vcmp.lt.s32.totalorder %v1730_v1, %v1667_v58  ;;  %vm5474_vm0 = vcmp.eq.f32.partialorder %v4108_v2, %v4261_v4 }
 0x1dc   : > { %v4389_v3 = vsel %vm1711_vm15, %v1709_v26, %v1710_v49  ;;  %v1673_v39 = vsel %vm5474_vm0, %v4165_v47, 128  ;;  %v1734_v63 = vsel %vm1733_vm5, %v1730_v1, %v1667_v58  ;;  %vm1735_vm1 = vcmp.lt.s32.totalorder %v1732_v51, %v1669_v19 }
 0x1dd   : > { %v1736_v18 = vsel %vm1735_vm1, %v1732_v51, %v1669_v19  ;;  %vm1737_vm13 = vcmp.lt.s32.totalorder %v1734_v63, %v1671_v10  ;;  %vm5401_vm2 = vcmp.eq.s32.totalorder %v4165_v47, %v4389_v3  ;;  %vm1780_vm7 = vcmp.eq.s32.totalorder %v4160_v31, %v4389_v3 }
 0x1de   : > { %v1738_v54 = vsel %vm1737_vm13, %v1734_v63, %v1671_v10  ;;  %vm1739_vm3 = vcmp.lt.s32.totalorder %v1736_v18, %v1673_v39  ;;  %v5475_v9 = vmov 0.0   ;;  %vm5410_vm8 = vcmp.eq.s32.totalorder %v4157_v62, %v4389_v3 }
 0x1df   : > { %v3043_v60 = vsel %vm5401_vm2, 1.0, %v5475_v9  ;;  %v3041_v2 = vsel %vm1780_vm7, 1.0, %v5475_v9  ;;  %v1740_v12 = vsel %vm1739_vm3, %v1736_v18, %v1673_v39  ;;  %v3039_v33 = vsel %vm5410_vm8, 1.0, %v5475_v9 }
 0x1e0   : > { %v4407_v21 = vsub.f32 %v3043_v60, %v3043_v60  ;;  %v4409_v38 = vsub.f32 %v3041_v2, %v3041_v2  ;;  %vm1741_vm9 = vcmp.lt.s32.totalorder %v1738_v54, %v1740_v12  ;;  %vm5412_vm6 = vcmp.eq.s32.totalorder %v4154_v28, %v4389_v3 }
 0x1e1   : > { %vm1774_vm10 = vcmp.eq.s32.totalorder %v4151_v57, %v4389_v3  ;;  %v1742_v24 = vsel %vm1741_vm9, %v1738_v54, %v1740_v12  ;;  %v4421_v48 = vsub.f32 %v3039_v33, %v3039_v33  ;;  %v3037_v5 = vsel %vm5412_vm6, 1.0, %v5475_v9 }
 0x1e2   : > { %v1743_v14 = vrot.slane %v1742_v24, 4  ;;  %v4429_v13 = vsub.f32 %v3037_v5, %v3037_v5  ;;  %v3035_v30 = vsel %vm1774_vm10, 1.0, %v5475_v9  ;;  %v5407_v41 = vand.u32 4294901760, %v4407_v21 }
 0x1e3   : > { %vm5416_vm11 = vcmp.eq.s32.totalorder %v4148_v27, %v4389_v3  ;;  %v5406_v45 = vand.u32 4294901760, %v4409_v38  ;;  %vm5422_vm4 = vcmp.eq.s32.totalorder %v4145_v6, %v4389_v3  ;;  %v5405_v50 = vand.u32 4294901760, %v4421_v48 }
 0x1e4   : > { %vm1744_vm15 = vcmp.lt.s32.totalorder %v1742_v24, %v1743_v14  ;;  %v4445_v22 = vsub.f32 %v4407_v21, %v5407_v41  ;;  %v3033_v55 = vsel %vm5416_vm11, 1.0, %v5475_v9  ;;  %v3031_v16 = vsel %vm5422_vm4, 1.0, %v5475_v9 }
 0x1e5   : > { %v1745_v61 = vsel %vm1744_vm15, %v1742_v24, %v1743_v14  ;;  %v4455_v8 = vsub.f32 %v3035_v30, %v3035_v30  ;;  %v4457_v15 = vsub.f32 %v3033_v55, %v3033_v55  ;;  %v4462_v17 = vsub.f32 %v4409_v38, %v5406_v45 }
 0x1e6   : > { %v1746_v43 = vrot.slane %v1745_v61, 2  ;;  %v4464_v26 = vsub.f32 %v3031_v16, %v3031_v16  ;;  %v4469_v56 = vsub.f32 %v4421_v48, %v5405_v50  ;;  %vm5431_vm5 = vcmp.eq.s32.totalorder %v4139_v20, %v4389_v3 }
 0x1e7   : > { %v1998_v29 = vand.u32 4294901760, %v4445_v22  ;;  %v3029_v49 = vsel %vm5431_vm5, 1.0, %v5475_v9  ;;  %v5404_v25 = vand.u32 4294901760, %v4429_v13  ;;  %vm5425_vm0 = vcmp.eq.s32.totalorder %v4136_v7, %v4389_v3 }
 0x1e8   : > { %vm1747_vm1 = vcmp.lt.s32.totalorder %v1745_v61, %v1746_v43  ;;  %v3027_v1 = vsel %vm5425_vm0, 1.0, %v5475_v9  ;;  %v4487_v51 = vsub.f32 %v3029_v49, %v3029_v49  ;;  %v5399_v63 = vand.u32 4294901760, %v4455_v8 }
 0x1e9   : > { %v1748_v10 = vsel %vm1747_vm1, %v1745_v61, %v1746_v43  ;;  %v4492_v39 = vsub.f32 %v4429_v13, %v5404_v25  ;;  %vm5403_vm13 = vcmp.eq.s32.totalorder %v4133_v36, %v4389_v3  ;;  %v5398_v54 = vand.u32 4294901760, %v4457_v15 }
 0x1ea   : > { %v1749_v18 = vrot.slane %v1748_v10, 1  ;;  %vm5402_vm3 = vcmp.eq.s32.totalorder %v4130_v46, %v4389_v3  ;;  %v4500_v60 = vsub.f32 %v3027_v1, %v3027_v1  ;;  %v4505_v2 = vsub.f32 %v4455_v8, %v5399_v63 }
 0x1eb   : > { %v3025_v12 = vsel %vm5403_vm13, 1.0, %v5475_v9  ;;  %v3023_v33 = vsel %vm5402_vm3, 1.0, %v5475_v9  ;;  %v4521_v14 = vsub.f32 %v4457_v15, %v5398_v54  ;;  %v5452_v49 = vmov 1.0  }
 0x1ec   : > { %vm1750_vm9 = vcmp.lt.s32.totalorder %v1748_v10, %v1749_v18  ;;  %v4516_v5 = vsub.f32 %v3025_v12, %v3025_v12  ;;  %v4526_v16 = vsub.f32 %v3023_v33, %v3023_v33 }
 0x1ed   : > { %v4523_v30 = vsel %vm1750_vm9, %v1748_v10, %v1749_v18  ;;  %vm5434_vm9 = vcmp.eq.s32.totalorder %v4127_v23, %v4389_v3 }
 0x1ee   : > { %vm5400_vm15 = vcmp.eq.s32.totalorder %v4165_v47, %v4523_v30  ;;  %vm1781_vm1 = vcmp.eq.s32.totalorder %v4160_v31, %v4523_v30  ;;  %vm1779_vm12 = vcmp.eq.s32.totalorder %v4157_v62, %v4523_v30  ;;  %vm1777_vm14 = vcmp.eq.s32.totalorder %v4154_v28, %v4523_v30 }
 0x1ef   : > { %v3044_v43 = vsel %vm5400_vm15, 1.0, %v5475_v9  ;;  %3045 = vmatprep.subr.msk.mxu0 %vm5400_vm15, %v5452_v49  ;;  %v3042_v1 = vsel %vm1781_vm1, 1.0, %v5475_v9  ;;  %v3040_v10 = vsel %vm1779_vm12, 1.0, %v5475_v9  ;;  %v3038_v18 = vsel %vm1777_vm14, 1.0, %v5475_v9 }
 0x1f0   : > { %v4557_v12 = vsub.f32 %v3044_v43, %v3044_v43  ;;  %3046 = vmatpush1.msk.msra.mxu0 %vm5401_vm2, %v5452_v49  ;;  %v4563_v33 = vsub.f32 %v3042_v1, %v3042_v1  ;;  %v4565_v54 = vsub.f32 %v3040_v10, %v3040_v10  ;;  %v4567_v63 = vsub.f32 %v3038_v18, %v3038_v18 }
 0x1f1   : > { %3047 = vmatprep.subr.msk.mxu0 %vm1781_vm1, %v5452_v49  ;;  %vm5413_vm15 = vcmp.eq.s32.totalorder %v4151_v57, %v4523_v30  ;;  %vm1773_vm2 = vcmp.eq.s32.totalorder %v4148_v27, %v4523_v30  ;;  %vm1771_vm3 = vcmp.eq.s32.totalorder %v4145_v6, %v4523_v30  ;;  %vm5423_vm13 = vcmp.eq.s32.totalorder %v4139_v20, %v4523_v30 }
 0x1f2   : > { %3048 = vmatpush1.msk.msra.mxu0 %vm1780_vm7, %v5452_v49  ;;  %v3036_v43 = vsel %vm5413_vm15, 1.0, %v5475_v9  ;;  %v5408_v1 = vand.u32 4294901760, %v4557_v12  ;;  %v3034_v10 = vsel %vm1773_vm2, 1.0, %v5475_v9  ;;  %v5409_v18 = vand.u32 4294901760, %v4563_v33 }
 0x1f3   : > { %3049 = vmatprep.subr.msk.mxu0 %vm1779_vm12, %v5452_v49  ;;  %v4601_v25 = vsub.f32 %v3036_v43, %v3036_v43  ;;  %v4603_v50 = vsub.f32 %v3034_v10, %v3034_v10  ;;  %v3032_v45 = vsel %vm1771_vm3, 1.0, %v5475_v9  ;;  %v5411_v41 = vand.u32 4294901760, %v4565_v54 }
 0x1f4   : > { %3050 = vmatpush1.msk.msra.mxu0 %vm5410_vm8, %v5452_v49  ;;  %v1991_v37 = vsub.f32 %v4557_v12, %v5408_v1  ;;  %v2003_v43 = vsub.f32 %v4563_v33, %v5409_v18  ;;  %v4620_v10 = vsub.f32 %v3032_v45, %v3032_v45  ;;  %v3030_v0 = vsel %vm5423_vm13, 1.0, %v5475_v9 }
 0x1f5   : > { %3051 = vmatprep.subr.msk.mxu0 %vm1777_vm14, %v5452_v49  ;;  %v2015_v1 = vsub.f32 %v4565_v54, %v5411_v41  ;;  %v4633_v55 = vsub.f32 %v3030_v0, %v3030_v0  ;;  %v5415_v18 = vand.u32 4294901760, %v4567_v63  ;;  %vm5424_vm8 = vcmp.eq.s32.totalorder %v4136_v7, %v4523_v30 }
 0x1f6   : > { %3052 = vmatpush1.msk.msra.mxu0 %vm5412_vm6, %v5452_v49  ;;  %v1992_v45 = vand.u32 4294901760, %v1991_v37  ;;  %v2004_v24 = vand.u32 4294901760, %v2003_v43  ;;  %v3028_v19 = vsel %vm5424_vm8, 1.0, %v5475_v9  ;;  %v5414_v0 = vand.u32 4294901760, %v4601_v25 }
 0x1f7   : > { %3053 = vmatprep.subr.msk.mxu0 %vm5413_vm15, %v5452_v49  ;;  %v2016_v41 = vand.u32 4294901760, %v2015_v1  ;;  %v2027_v61 = vsub.f32 %v4567_v63, %v5415_v18  ;;  %v4654_v58 = vsub.f32 %v3028_v19, %v3028_v19  ;;  %vm5427_vm6 = vcmp.eq.s32.totalorder %v4133_v36, %v4523_v30 }
 0x1f8   : > { %3054 = vmatpush1.msk.msra.mxu0 %vm1774_vm10, %v5452_v49  ;;  %1993 = vmatprep.subr.mxu1 %v1992_v45  ;;  %v2039_v37 = vsub.f32 %v4601_v25, %v5414_v0  ;;  %v3026_v1 = vsel %vm5427_vm6, 1.0, %v5475_v9  ;;  %vm5433_vm15 = vcmp.eq.s32.totalorder %v4130_v46, %v4523_v30  ;;  %v2058_v18 = vand.u32 4294901760, %v4521_v14 }
 0x1f9   : > { %3055 = vmatprep.subr.msk.mxu0 %vm1773_vm2, %v5452_v49  ;;  %1999 = vmatpush1.msra.mxu1 %v1998_v29  ;;  %v2028_v43 = vand.u32 4294901760, %v2027_v61  ;;  %v4678_v45 = vsub.f32 %v3026_v1, %v3026_v1  ;;  %v3024_v0 = vsel %vm5433_vm15, 1.0, %v5475_v9  ;;  %v5476_v22 = vand.u32 4294901760, %v4603_v50 }
 0x1fa   : > { %3056 = vmatpush1.msk.msra.mxu0 %vm5416_vm11, %v5452_v49  ;;  %2005 = vmatprep.subr.mxu1 %v2004_v24  ;;  %v2040_v19 = vand.u32 4294901760, %v2039_v37  ;;  %v4692_v61 = vsub.f32 %v3024_v0, %v3024_v0  ;;  %v5419_v1 = vand.u32 4294901760, %v4620_v10  ;;  %v5477_v14 = vand.u32 4294901760, %v4462_v17 }
 0x1fb   : > { %v2051_v29 = vsub.f32 %v4603_v50, %v5476_v22  ;;  %3057 = vmatprep.subr.msk.mxu0 %vm1771_vm3, %v5452_v49  ;;  %vm1761_vm11 = vcmp.eq.s32.totalorder %v4127_v23, %v4523_v30  ;;  %v5478_v24 = vand.u32 4294901760, %v4464_v26  ;;  %v3021_v0 = vsel %vm5434_vm9, 1.0, %v5475_v9 }
 0x1fc   : > { %2011 = vmatpush1.msra.mxu1 %v5477_v14  ;;  %3058 = vmatpush1.msk.msra.mxu0 %vm5422_vm4, %v5452_v49  ;;  %v2063_v14 = vsub.f32 %v4620_v10, %v5419_v1  ;;  %v4722_v34 = vsub.f32 %v3021_v0, %v3021_v0  ;;  %v5479_v22 = vand.u32 4294901760, %v4469_v56  ;;  %v5480_v1 = vand.u32 4294901760, %v4633_v55 }
 0x1fd   : > { %v2069_v37 = vsub.f32 %v4464_v26, %v5478_v24  ;;  %2017 = vmatprep.subr.mxu1 %v2016_v41  ;;  %v2052_v17 = vand.u32 4294901760, %v2051_v29  ;;  %v3022_v24 = vsel %vm1761_vm11, 1.0, %v5475_v9  ;;  %3059 = vmatprep.subr.msk.mxu0 %vm5423_vm13, %v5452_v49  ;;  %vm1759_vm4 = vcmp.eq.s32.totalorder %v4124_v44, %v4523_v30 }
 0x1fe   : > { %2023 = vmatpush1.msra.mxu1 %v5479_v22  ;;  %v4730_v41 = vsub.f32 %v3022_v24, %v3022_v24  ;;  %v2075_v6 = vsub.f32 %v4633_v55, %v5480_v1  ;;  %3060 = vmatpush1.msk.msra.mxu0 %vm5431_vm5, %v5452_v49  ;;  %v2064_v0 = vand.u32 4294901760, %v2063_v14  ;;  %v3020_v56 = vsel %vm1759_vm4, 1.0, %v5475_v9 }
 0x1ff   : > { %v2070_v29 = vand.u32 4294901760, %v2069_v37  ;;  %2029 = vmatprep.subr.mxu1 %v2028_v43  ;;  %v5426_v37 = vand.u32 4294901760, %v4487_v51  ;;  %vm1758_vm13 = vcmp.eq.s32.totalorder %v4124_v44, %v4389_v3  ;;  %3061 = vmatprep.subr.msk.mxu0 %vm5424_vm8, %v5452_v49  ;;  %v5481_v1 = vand.u32 4294901760, %v4492_v39 }
 0x200   : > { %v2076_v43 = vand.u32 4294901760, %v2075_v6  ;;  %v4754_v22 = vsub.f32 %v3020_v56, %v3020_v56  ;;  %v3019_v14 = vsel %vm1758_vm13, 1.0, %v5475_v9  ;;  %v5428_v24 = vand.u32 4294901760, %v4654_v58  ;;  %3062 = vmatpush1.msk.msra.mxu0 %vm5425_vm0, %v5452_v49 }
 0x201   : > { %2035 = vmatpush1.msra.mxu1 %v5481_v1  ;;  %v2081_v39 = vsub.f32 %v4487_v51, %v5426_v37  ;;  %v4768_v6 = vsub.f32 %v3019_v14, %v3019_v14  ;;  %vm1757_vm8 = vcmp.eq.s32.totalorder %v4121_v35, %v4523_v30  ;;  %v5432_v56 = vand.u32 4294901760, %v4500_v60  ;;  %3063 = vmatprep.subr.msk.mxu0 %vm5427_vm6, %v5452_v49 }
 0x202   : > { %2041 = vmatprep.subr.mxu1 %v2040_v19  ;;  %v5482_v1 = vand.u32 4294901760, %v4505_v2  ;;  %v2087_v19 = vsub.f32 %v4654_v58, %v5428_v24  ;;  %v3018_v14 = vsel %vm1757_vm8, 1.0, %v5475_v9  ;;  %vm1756_vm0 = vcmp.eq.s32.totalorder %v4121_v35, %v4389_v3 }
 0x203   : > { %vm5483_vm6 = vcmp.eq.s32.totalorder %v4133_v36, %v4389_v3  ;;  %v2082_v2 = vand.u32 4294901760, %v2081_v39  ;;  %v2093_v24 = vsub.f32 %v4500_v60, %v5432_v56  ;;  %v3017_v7 = vsel %vm1756_vm0, 1.0, %v5475_v9 }
 0x204   : > { %2047 = vmatpush1.msra.mxu1 %v5482_v1  ;;  %3064 = vmatpush1.msk.msra.mxu0 %vm5483_vm6, %v5452_v49  ;;  %v4793_v1 = vsub.f32 %v3018_v14, %v3018_v14  ;;  %v2088_v37 = vand.u32 4294901760, %v2087_v19  ;;  %v5484_v39 = vand.u32 4294901760, %v4678_v45  ;;  %vm1755_vm6 = vcmp.eq.s32.totalorder %v4118_v52, %v4523_v30 }
 0x205   : > { %2053 = vmatprep.subr.mxu1 %v2052_v17  ;;  %3065 = vmatprep.subr.msk.mxu0 %vm5433_vm15, %v5452_v49  ;;  %v4806_v17 = vsub.f32 %v3017_v7, %v3017_v7  ;;  %vm5485_vm5 = vcmp.eq.s32.totalorder %v4130_v46, %v4389_v3  ;;  %v2094_v56 = vand.u32 4294901760, %v2093_v24  ;;  %v3016_v7 = vsel %vm1755_vm6, 1.0, %v5475_v9 }
 0x206   : > { %2059 = vmatpush1.msra.mxu1 %v2058_v18  ;;  %v2099_v14 = vsub.f32 %v4678_v45, %v5484_v39  ;;  %3066 = vmatpush1.msk.msra.mxu0 %vm5485_vm5, %v5452_v49  ;;  %v5435_v18 = vand.u32 4294901760, %v4516_v5  ;;  %vm5455_vm15 = vcmp.eq.s32.totalorder %v4118_v52, %v4389_v3  ;;  %v4828_v39 = vsub.f32 %v3016_v7, %v3016_v7 }
 0x207   : > { %2065 = vmatprep.subr.mxu1 %v2064_v0  ;;  %3067 = vmatprep.subr.msk.mxu0 %vm1761_vm11, %v5452_v49  ;;  %v3015_v0 = vsel %vm5455_vm15, 1.0, %v5475_v9  ;;  %v5436_v24 = vand.u32 4294901760, %v4692_v61  ;;  %vm5450_vm5 = vcmp.eq.s32.totalorder %v4113_v42, %v4523_v30  ;;  %v5547_v31 = vand.u32 4294901760, %v4654_v58 }
 0x208   : > { %2071 = vmatpush1.msra.mxu1 %v2070_v29  ;;  %v2100_v19 = vand.u32 4294901760, %v2099_v14  ;;  %3068 = vmatpush1.msk.msra.mxu0 %vm5434_vm9, %v5452_v49  ;;  %v2105_v29 = vsub.f32 %v4516_v5, %v5435_v18  ;;  %v4842_v14 = vsub.f32 %v3015_v0, %v3015_v0  ;;  %v3014_v0 = vsel %vm5450_vm5, 1.0, %v5475_v9 }
 0x209   : > { %2077 = vmatprep.subr.mxu1 %v2076_v43  ;;  %3069 = vmatprep.subr.msk.mxu0 %vm1759_vm4, %v5452_v49  ;;  %v2111_v43 = vsub.f32 %v4692_v61, %v5436_v24  ;;  %vm5454_vm9 = vcmp.eq.s32.totalorder %v4113_v42, %v4389_v3  ;;  %v4865_v7 = vsub.f32 %v3014_v0, %v3014_v0  ;;  %v5486_v24 = vand.u32 4294901760, %v4526_v16 }
 0x20a   : > { %2083 = vmatpush1.msra.mxu1 %v2082_v2  ;;  %3070 = vmatpush1.msk.msra.mxu0 %vm1758_vm13, %v5452_v49  ;;  %v2106_v2 = vand.u32 4294901760, %v2105_v29  ;;  %v3013_v46 = vsel %vm5454_vm9, 1.0, %v5475_v9  ;;  %v5487_v29 = vand.u32 4294901760, %v4730_v41  ;;  %v5445_v9 = vand.u32 4294901760, %v4754_v22 }
 0x20b   : > { %2089 = vmatprep.subr.mxu1 %v2088_v37  ;;  %v2117_v23 = vsub.f32 %v4526_v16, %v5486_v24  ;;  %3071 = vmatprep.subr.msk.mxu0 %vm1757_vm8, %v5452_v49  ;;  %v2112_v18 = vand.u32 4294901760, %v2111_v43  ;;  %v4878_v37 = vsub.f32 %v3013_v46, %v3013_v46  ;;  %v5444_v24 = vand.u32 4294901760, %v4722_v34 }
 0x20c   : > { %2095 = vmatpush1.msra.mxu1 %v2094_v56  ;;  %v2123_v0 = vsub.f32 %v4730_v41, %v5487_v29  ;;  %3072 = vmatpush1.msk.msra.mxu0 %vm1756_vm0, %v5452_v49  ;;  %v5446_v56 = vand.u32 4294901760, %v4768_v6  ;;  %v5447_v46 = vand.u32 4294901760, %v4793_v1 }
 0x20d   : > { %2101 = vmatprep.subr.mxu1 %v2100_v19  ;;  %v2118_v44 = vand.u32 4294901760, %v2117_v23  ;;  %3073 = vmatprep.subr.msk.mxu0 %vm1755_vm6, %v5452_v49  ;;  %v2129_v29 = vsub.f32 %v4722_v34, %v5444_v24  ;;  %v5451_v23 = vand.u32 4294901760, %v4806_v17  ;;  %v5488_v19 = vand.u32 4294901760, %v4828_v39 }
 0x20e   : > { %2107 = vmatpush1.msra.mxu1 %v2106_v2  ;;  %v2124_v43 = vand.u32 4294901760, %v2123_v0  ;;  %3074 = vmatpush1.msk.msra.mxu0 %vm5455_vm15, %v5452_v49  ;;  %v2135_v2 = vsub.f32 %v4754_v22, %v5445_v9  ;;  %v2141_v0 = vsub.f32 %v4768_v6, %v5446_v56  ;;  %v2147_v24 = vsub.f32 %v4793_v1, %v5447_v46 }
 0x20f   : > { %2113 = vmatprep.subr.mxu1 %v2112_v18  ;;  %3075 = vmatprep.subr.msk.mxu0 %vm5450_vm5, %v5452_v49  ;;  %v2130_v18 = vand.u32 4294901760, %v2129_v29  ;;  %v2153_v9 = vsub.f32 %v4806_v17, %v5451_v23  ;;  %v2159_v52 = vsub.f32 %v4828_v39, %v5488_v19  ;;  %v5493_v19 = vand.u32 4294901760, %v4239_v11  ;;  %v5510_v29 = vld [vmem:[#allocation9_spill] sm:$0xff] }
 0x210   : > { %2119 = vmatpush1.msra.mxu1 %v2118_v44  ;;  %3076 = vmatpush1.msk.msra.mxu0 %vm5454_vm9, %v5452_v49  ;;  %v2136_v46 = vand.u32 4294901760, %v2135_v2  ;;  %v5489_v44 = vlaneseq  ;;  %v2142_v23 = vand.u32 4294901760, %v2141_v0  ;;  %v2148_v56 = vand.u32 4294901760, %v2147_v24 }
 0x211   : > { %2125 = vmatprep.subr.mxu1 %v2124_v43  ;;  %2222 = vmatprep.subr.mxu0 %v4557_v12  ;;  %v5492_v49 = vand.u32 4294901760, %v4842_v14  ;;  %vm5495_vm9 = vcmp.lt.f32.partialorder %v4162_v32, inf  ;;  %vm5496_vm15 = vcmp.lt.f32.partialorder %v4261_v4, inf  ;;  %v2154_v11 = vand.u32 4294901760, %v2153_v9 }
 0x212   : > { %vm4932_vm5 = vcmp.lt.s32.totalorder %v5489_v44, 256  ;;  %2131 = vmatpush1.msra.mxu1 %v2130_v18  ;;  %1982 = vmatmul.mubr.f32.vlgmr.msra.gmra.mxu0 %v5493_v19  ;;  %v5494_v18 = vand.u32 4294901760, %v4865_v7  ;;  %v2739_v24 = vsel %vm5495_vm9, %v4389_v3, 0  ;;  %v5497_v44 = vrot.slane %v4375_v59, %v4317_v53 }
 0x213   : > { %v2165_v43 = vsub.f32 %v4842_v14, %v5492_v49  ;;  %2137 = vmatprep.subr.mxu1 %v2136_v46  ;;  %v2740_v49 = vsel %vm5496_vm15, %v4523_v30, 0  ;;  %2225 = vmatpush1.msra.mxu0 %v4407_v21  ;;  %v5498_v46 = vand.u32 4294901760, %v4878_v37  ;;  %v2160_v4 = vand.u32 4294901760, %v2159_v52 }
 0x214   : > { %v2171_v0 = vsub.f32 %v4865_v7, %v5494_v18  ;;  %v2812_v2 = vrot.slane %v5497_v44, %v4317_v53  ;;  %2143 = vmatpush1.msra.mxu1 %v2142_v23  ;;  %v2754_v18 = vcombine.low %v2739_v24, %v2740_v49  ;;  %2228 = vmatprep.subr.mxu0 %v4563_v33  ;;  %v5520_v24 = vld [vmem:[#allocation10_spill] sm:$0xff]  ;;  %v5522_v49 = vand.u32 4294901760, %v4557_v12 }
 0x215   : > { %v2177_v19 = vsub.f32 %v4878_v37, %v5498_v46  ;;  %2149 = vmatprep.subr.mxu1 %v2148_v56  ;;  %2231 = vmatpush1.msra.mxu0 %v4409_v38  ;;  %v2166_v59 = vand.u32 4294901760, %v2165_v43  ;;  %vm5500_vm15 = vcmp.eq.s32.totalorder %v4165_v47, %v4523_v30  ;;  %vm5501_vm9 = vcmp.eq.s32.totalorder %v4165_v47, %v4389_v3  ;;  %v5515_v43 = vld [vmem:[#allocation8_spill] sm:$0xff] }
 0x216   : > { %2814 = vst.msk [vmem:[%s270_s22] sm:$0x3] %vm4932_vm5, %v2812_v2  ;;  %2155 = vmatpush1.msra.mxu1 %v2154_v11  ;;  %v2761_v9 = vrot.slane %v2754_v18, %v4317_v53  ;;  %2234 = vmatprep.subr.mxu0 %v4565_v54  ;;  %v2172_v23 = vand.u32 4294901760, %v2171_v0  ;;  %v5518_v2 = vmov 0.0   ;;  %v5519_v0 = vld [vmem:[#allocation7_spill] sm:$0xff]  ;;  %v5524_v11 = vand.u32 4294901760, %v4407_v21 }
 0x217   : > { %2161 = vmatprep.subr.mxu1 %v2160_v4  ;;  %2237 = vmatpush1.msra.mxu0 %v4421_v48  ;;  %v2178_v56 = vand.u32 4294901760, %v2177_v19  ;;  %v5499_v4 = vmov 1.0   ;;  %v5525_v46 = vand.u32 4294901760, %v4563_v33  ;;  %v5526_v12 = vand.u32 4294901760, %v4409_v38  ;;  %v5528_v19 = vld [vmem:[#allocation5_spill] sm:$0xff] }
 0x218   : > { %2167 = vmatpush1.msra.mxu1 %v2166_v59  ;;  %v2768_v52 = vrot.slane %v2761_v9, %v4317_v53  ;;  %2240 = vmatprep.subr.mxu0 %v4567_v63  ;;  %v5506_v53 = vld [vmem:[#allocation11_spill] sm:$0xff]  ;;  %v5527_v21 = vand.u32 4294901760, %v4565_v54  ;;  %v5529_v33 = vand.u32 4294901760, %v4421_v48  ;;  %v5531_v38 = vand.u32 4294901760, %v4567_v63 }
 0x219   : > { %2173 = vmatprep.subr.mxu1 %v2172_v23  ;;  %2243 = vmatpush1.msra.mxu0 %v4429_v13  ;;  %v5533_v54 = vand.u32 4294901760, %v4429_v13  ;;  %v5535_v48 = vand.u32 4294901760, %v4601_v25  ;;  %v5536_v63 = vand.u32 4294901760, %v5520_v24  ;;  %v5537_v18 = vand.u32 4294901760, %v4455_v8 }
 0x21a   : > { %2179 = vmatpush1.msra.mxu1 %v2178_v56  ;;  %2773 = vst.msk [vmem:[%s231_s29] sm:$0x3] %vm4932_vm5, %v2768_v52  ;;  %2246 = vmatprep.subr.mxu0 %v4601_v25  ;;  %vm5502_vm5 = vcmp.eq.s32.totalorder %v4157_v62, %v4389_v3  ;;  %v5539_v13 = vand.u32 4294901760, %v4603_v50  ;;  %v5541_v25 = vand.u32 4294901760, %v4457_v15 }
 0x21b   : > { %3077 = vmatprep.subr.msk.mxu1 %vm5500_vm15, %v5499_v4  ;;  %2249 = vmatpush1.msra.mxu0 %v4455_v8  ;;  %vm5503_vm15 = vcmp.eq.s32.totalorder %v4154_v28, %v4389_v3  ;;  %v5542_v8 = vand.u32 4294901760, %v4620_v10 }
 0x21c   : > { %2214 = vmatmul.mubr.f32.vlgmr.msra.gmra.mxu1 %v4115_v40  ;;  %2252 = vmatprep.subr.mxu0 %v4603_v50  ;;  %v5543_v50 = vand.u32 4294901760, %v4464_v26 }
 0x21d   : > { %3078 = vmatpush1.msk.msra.mxu1 %vm5501_vm9, %v5499_v4  ;;  %2255 = vmatpush1.msra.mxu0 %v4457_v15  ;;  %vm5504_vm9 = vcmp.eq.s32.totalorder %v4151_v57, %v4523_v30  ;;  %v5546_v15 = vand.u32 4294901760, %v4487_v51 }
 0x21e   : > { %3079 = vmatprep.subr.msk.mxu1 %vm1781_vm1, %v5499_v4  ;;  %2258 = vmatprep.subr.mxu0 %v4620_v10  ;;  %v5572_v10 = vand.u32 4294901760, %v4865_v7 }
 0x21f   : > { %3080 = vmatpush1.msk.msra.mxu1 %vm1780_vm7, %v5499_v4  ;;  %2261 = vmatpush1.msra.mxu0 %v4464_v26  ;;  %v5549_v26 = vand.u32 4294901760, %v4500_v60 }
 0x220   : > { %3081 = vmatprep.subr.msk.mxu1 %vm1779_vm12, %v5499_v4  ;;  %2264 = vmatprep.subr.mxu0 %v4633_v55 }
 0x221   : > { %3082 = vmatpush1.msk.msra.mxu1 %vm5502_vm5, %v5499_v4  ;;  %2267 = vmatpush1.msra.mxu0 %v4487_v51  ;;  %vm5505_vm5 = vcmp.eq.s32.totalorder %v4148_v27, %v4389_v3  ;;  %v5555_v51 = vand.u32 4294901760, %v4526_v16 }
 0x222   : > { %3083 = vmatprep.subr.msk.mxu1 %vm1777_vm14, %v5499_v4  ;;  %2270 = vmatprep.subr.mxu0 %v4654_v58  ;;  %v5552_v58 = vand.u32 4294901760, %v4516_v5 }
 0x223   : > { %3084 = vmatpush1.msk.msra.mxu1 %vm5503_vm15, %v5499_v4  ;;  %2273 = vmatpush1.msra.mxu0 %v4500_v60  ;;  %vm5507_vm15 = vcmp.eq.s32.totalorder %v5506_v53, %v4389_v3  ;;  %v5558_v60 = vand.u32 4294901760, %v4722_v34 }
 0x224   : > { %3085 = vmatprep.subr.msk.mxu1 %vm5504_vm9, %v5499_v4  ;;  %2276 = vmatprep.subr.mxu0 %v4678_v45  ;;  %vm5508_vm9 = vcmp.eq.s32.totalorder %v4139_v20, %v4523_v30 }
 0x225   : > { %3086 = vmatpush1.msk.msra.mxu1 %vm1774_vm10, %v5499_v4  ;;  %2279 = vmatpush1.msra.mxu0 %v4516_v5  ;;  %v5562_v5 = vand.u32 4294901760, %v4768_v6 }
 0x226   : > { %3087 = vmatprep.subr.msk.mxu1 %vm1773_vm2, %v5499_v4  ;;  %2282 = vmatprep.subr.mxu0 %v4692_v61 }
 0x227   : > { %3088 = vmatpush1.msk.msra.mxu1 %vm5505_vm5, %v5499_v4  ;;  %2285 = vmatpush1.msra.mxu0 %v4526_v16  ;;  %vm5509_vm5 = vcmp.eq.s32.totalorder %v4139_v20, %v4389_v3  ;;  %v5570_v16 = vand.u32 4294901760, %v4842_v14 }
 0x228   : > { %3089 = vmatprep.subr.msk.mxu1 %vm1771_vm3, %v5499_v4  ;;  %2288 = vmatprep.subr.mxu0 %v4730_v41 }
 0x229   : > { %3090 = vmatpush1.msk.msra.mxu1 %vm5507_vm15, %v5499_v4  ;;  %2291 = vmatpush1.msra.mxu0 %v4722_v34  ;;  %vm5511_vm15 = vcmp.eq.s32.totalorder %v5510_v29, %v4523_v30  ;;  %v5564_v34 = vand.u32 4294901760, %v4793_v1 }
 0x22a   : > { %3091 = vmatprep.subr.msk.mxu1 %vm5508_vm9, %v5499_v4  ;;  %2294 = vmatprep.subr.mxu0 %v4754_v22  ;;  %vm5512_vm9 = vcmp.eq.s32.totalorder %v5510_v29, %v4389_v3 }
 0x22b   : > { %3092 = vmatpush1.msk.msra.mxu1 %vm5509_vm5, %v5499_v4  ;;  %2297 = vmatpush1.msra.mxu0 %v4768_v6  ;;  %vm5513_vm5 = vcmp.eq.s32.totalorder %v4133_v36, %v4523_v30 }
 0x22c   : > { %3093 = vmatprep.subr.msk.mxu1 %vm5511_vm15, %v5499_v4  ;;  %2300 = vmatprep.subr.mxu0 %v4793_v1  ;;  %vm5514_vm15 = vcmp.eq.s32.totalorder %v4133_v36, %v4389_v3 }
 0x22d   : > { %3094 = vmatpush1.msk.msra.mxu1 %vm5512_vm9, %v5499_v4  ;;  %2303 = vmatpush1.msra.mxu0 %v4806_v17  ;;  %vm5516_vm9 = vcmp.eq.s32.totalorder %v5515_v43, %v4523_v30 }
 0x22e   : > { %3095 = vmatprep.subr.msk.mxu1 %vm5513_vm5, %v5499_v4  ;;  %2306 = vmatprep.subr.mxu0 %v4828_v39  ;;  %vm5517_vm5 = vcmp.eq.s32.totalorder %v5515_v43, %v4389_v3 }
 0x22f   : > { %3096 = vmatpush1.msk.msra.mxu1 %vm5514_vm15, %v5499_v4  ;;  %2309 = vmatpush1.msra.mxu0 %v4842_v14  ;;  %vm5521_vm15 = vcmp.eq.s32.totalorder %v5519_v0, %v4389_v3 }
 0x230   : > { %3097 = vmatprep.subr.msk.mxu1 %vm5516_vm9, %v5499_v4  ;;  %2312 = vmatprep.subr.mxu0 %v4865_v7  ;;  %vm5530_vm9 = vcmp.eq.s32.totalorder %v5528_v19, %v4389_v3 }
 0x231   : > { %3098 = vmatpush1.msk.msra.mxu1 %vm5517_vm5, %v5499_v4  ;;  %2315 = vmatpush1.msra.mxu0 %v4878_v37  ;;  %vm5532_vm5 = vcmp.eq.s32.totalorder %v4113_v42, %v4523_v30 }
 0x232   : > { %2348 = vmatprep.mubr.f32.mxu0 %v5518_v2  ;;  %3099 = vmatprep.subr.msk.mxu1 %vm1761_vm11, %v5499_v4 }
 0x233   : > { %2351 = vmatmul.mubr.f32.vlgmr.msra.gmra.mxu0 %v5520_v24  ;;  %3100 = vmatpush1.msk.msra.mxu1 %vm5521_vm15, %v5499_v4  ;;  %vm5534_vm15 = vcmp.eq.s32.totalorder %v4113_v42, %v4389_v3 }
 0x234   : > { %2466 = vmatprep.subr.mxu0 %v5522_v49  ;;  %3101 = vmatprep.subr.msk.mxu1 %vm1759_vm4, %v5499_v4 }
 0x235   : > { %2470 = vmatpush1.msra.mxu0 %v5524_v11  ;;  %3102 = vmatpush1.msk.msra.mxu1 %vm1758_vm13, %v5499_v4 }
 0x236   : > { %2474 = vmatprep.subr.mxu0 %v5525_v46  ;;  %3103 = vmatprep.subr.msk.mxu1 %vm1757_vm8, %v5499_v4 }
 0x237   : > { %2478 = vmatpush1.msra.mxu0 %v5526_v12  ;;  %3104 = vmatpush1.msk.msra.mxu1 %vm1756_vm0, %v5499_v4 }
 0x238   : > { %2482 = vmatprep.subr.mxu0 %v5527_v21  ;;  %3105 = vmatprep.subr.msk.mxu1 %vm1755_vm6, %v5499_v4 }
 0x239   : > { %2486 = vmatpush1.msra.mxu0 %v5529_v33  ;;  %3106 = vmatpush1.msk.msra.mxu1 %vm5530_vm9, %v5499_v4  ;;  %vm5538_vm9 = vcmp.eq.s32.totalorder %v4165_v47, %v4523_v30 }
 0x23a   : > { %2490 = vmatprep.subr.mxu0 %v5531_v38  ;;  %3107 = vmatprep.subr.msk.mxu1 %vm5532_vm5, %v5499_v4  ;;  %vm5540_vm5 = vcmp.eq.s32.totalorder %v4165_v47, %v4389_v3  ;;  %v5544_v47 = vand.u32 4294901760, %v4633_v55  ;;  %v5566_v55 = vand.u32 4294901760, %v4806_v17 }
 0x23b   : > { %2494 = vmatpush1.msra.mxu0 %v5533_v54  ;;  %3108 = vmatpush1.msk.msra.mxu1 %vm5534_vm15, %v5499_v4  ;;  %vm5563_vm15 = vcmp.eq.s32.totalorder %v5510_v29, %v4523_v30 }
 0x23c   : > { %2453 = vmatprep.mubr.f32.mxu1 %v5518_v2  ;;  %2498 = vmatprep.subr.mxu0 %v5535_v48 }
 0x23d   : > { %2457 = vmatmul.mubr.f32.vlgmr.msra.gmra.mxu1 %v5536_v63  ;;  %2502 = vmatpush1.msra.mxu0 %v5537_v18 }
 0x23e   : > { %3109 = vmatprep.subr.msk.mxu1 %vm5538_vm9, %v5499_v4  ;;  %2506 = vmatprep.subr.mxu0 %v5539_v13  ;;  %vm5565_vm9 = vcmp.eq.s32.totalorder %v5510_v29, %v4389_v3 }
 0x23f   : > { %3110 = vmatpush1.msk.msra.mxu1 %vm5540_vm5, %v5499_v4  ;;  %2510 = vmatpush1.msra.mxu0 %v5541_v25  ;;  %vm5567_vm5 = vcmp.eq.s32.totalorder %v4133_v36, %v4523_v30 }
 0x240   : > { %3111 = vmatprep.subr.msk.mxu1 %vm1781_vm1, %v5499_v4  ;;  %2514 = vmatprep.subr.mxu0 %v5542_v8  ;;  %vm5545_vm1 = vcmp.eq.s32.totalorder %v4157_v62, %v4389_v3  ;;  %v5551_v62 = vand.u32 4294901760, %v4678_v45  ;;  %v5574_v45 = vand.u32 4294901760, %v4878_v37 }
 0x241   : > { %3112 = vmatpush1.msk.msra.mxu1 %vm1780_vm7, %v5499_v4  ;;  %2518 = vmatpush1.msra.mxu0 %v5543_v50  ;;  %vm5550_vm7 = vcmp.eq.s32.totalorder %v4151_v57, %v4523_v30  ;;  %v5556_v57 = vand.u32 4294901760, %v4730_v41 }
 0x242   : > { %3113 = vmatprep.subr.msk.mxu1 %vm1779_vm12, %v5499_v4  ;;  %2522 = vmatprep.subr.mxu0 %v5544_v47  ;;  %vm5548_vm12 = vcmp.eq.s32.totalorder %v4154_v28, %v4389_v3  ;;  %v5553_v28 = vand.u32 4294901760, %v4692_v61 }
 0x243   : > { %3114 = vmatpush1.msk.msra.mxu1 %vm5545_vm1, %v5499_v4  ;;  %2526 = vmatpush1.msra.mxu0 %v5546_v15  ;;  %vm5569_vm1 = vcmp.eq.s32.totalorder %v4133_v36, %v4389_v3 }
 0x244   : > { %3115 = vmatprep.subr.msk.mxu1 %vm1777_vm14, %v5499_v4  ;;  %2530 = vmatprep.subr.mxu0 %v5547_v31  ;;  %vm5554_vm14 = vcmp.eq.s32.totalorder %v4148_v27, %v4389_v3  ;;  %v5560_v27 = vand.u32 4294901760, %v4754_v22 }
 0x245   : > { %3116 = vmatpush1.msk.msra.mxu1 %vm5548_vm12, %v5499_v4  ;;  %2534 = vmatpush1.msra.mxu0 %v5549_v26  ;;  %vm5571_vm12 = vcmp.eq.s32.totalorder %v5515_v43, %v4523_v30 }
 0x246   : > { %3117 = vmatprep.subr.msk.mxu1 %vm5550_vm7, %v5499_v4  ;;  %2538 = vmatprep.subr.mxu0 %v5551_v62  ;;  %vm5573_vm7 = vcmp.eq.s32.totalorder %v5515_v43, %v4389_v3 }
 0x247   : > { %3118 = vmatpush1.msk.msra.mxu1 %vm1774_vm10, %v5499_v4  ;;  %2542 = vmatpush1.msra.mxu0 %v5552_v58  ;;  %vm5559_vm10 = vcmp.eq.s32.totalorder %v4139_v20, %v4523_v30 }
 0x248   : > { %3119 = vmatprep.subr.msk.mxu1 %vm1773_vm2, %v5499_v4  ;;  %2546 = vmatprep.subr.mxu0 %v5553_v28  ;;  %vm5557_vm2 = vcmp.eq.s32.totalorder %v5506_v53, %v4389_v3 }
 0x249   : > { %3120 = vmatpush1.msk.msra.mxu1 %vm5554_vm14, %v5499_v4  ;;  %2550 = vmatpush1.msra.mxu0 %v5555_v51  ;;  %vm5575_vm14 = vcmp.eq.s32.totalorder %v5519_v0, %v4389_v3 }
 0x24a   : > { %3121 = vmatprep.subr.msk.mxu1 %vm1771_vm3, %v5499_v4  ;;  %2554 = vmatprep.subr.mxu0 %v5556_v57  ;;  %vm5561_vm3 = vcmp.eq.s32.totalorder %v4139_v20, %v4389_v3  ;;  %v5568_v20 = vand.u32 4294901760, %v4828_v39 }
 0x24b   : > { %3122 = vmatpush1.msk.msra.mxu1 %vm5557_vm2, %v5499_v4  ;;  %2558 = vmatpush1.msra.mxu0 %v5558_v60 }
 0x24c   : > { %3123 = vmatprep.subr.msk.mxu1 %vm5559_vm10, %v5499_v4  ;;  %2562 = vmatprep.subr.mxu0 %v5560_v27 }
 0x24d   : > { %3124 = vmatpush1.msk.msra.mxu1 %vm5561_vm3, %v5499_v4  ;;  %2566 = vmatpush1.msra.mxu0 %v5562_v5 }
 0x24e   : > { %3125 = vmatprep.subr.msk.mxu1 %vm5563_vm15, %v5499_v4  ;;  %2570 = vmatprep.subr.mxu0 %v5564_v34 }
 0x24f   : > { %3126 = vmatpush1.msk.msra.mxu1 %vm5565_vm9, %v5499_v4  ;;  %2574 = vmatpush1.msra.mxu0 %v5566_v55 }
 0x250   : > { %3127 = vmatprep.subr.msk.mxu1 %vm5567_vm5, %v5499_v4  ;;  %2578 = vmatprep.subr.mxu0 %v5568_v20 }
 0x251   : > { %3128 = vmatpush1.msk.msra.mxu1 %vm5569_vm1, %v5499_v4  ;;  %2582 = vmatpush1.msra.mxu0 %v5570_v16 }
 0x252   : > { %3129 = vmatprep.subr.msk.mxu1 %vm5571_vm12, %v5499_v4  ;;  %2586 = vmatprep.subr.mxu0 %v5572_v10 }
 0x253   : > { %3130 = vmatpush1.msk.msra.mxu1 %vm5573_vm7, %v5499_v4  ;;  %2590 = vmatpush1.msra.mxu0 %v5574_v45 }
 0x254   : > { %2623 = vmatprep.mubr.f32.mxu0 %v5518_v2  ;;  %3131 = vmatprep.subr.msk.mxu1 %vm1761_vm11, %v5499_v4  ;;  %vm5576_vm11 = vcmp.eq.s32.totalorder %v5528_v19, %v4389_v3 }
 0x255   : > { %2625 = vmatmul.mubr.f32.vlgmr.msra.gmra.mxu0 %v4115_v40  ;;  %3132 = vmatpush1.msk.msra.mxu1 %vm5575_vm14, %v5499_v4 }
 0x256   : > { %2727 = vmatprep.mubr.f32.mxu1 %v5518_v2  ;;  %3133 = vmatprep.subr.msk.mxu1 %vm1759_vm4, %v5499_v4  ;;  %vm5577_vm4 = vcmp.eq.s32.totalorder %v4113_v42, %v4523_v30 }
 0x257   : > { %3134 = vmatpush1.msk.msra.mxu1 %vm1758_vm13, %v5499_v4 }
 0x258   : > { %3135 = vmatprep.subr.msk.mxu1 %vm1757_vm8, %v5499_v4  ;;  %vm5578_vm8 = vcmp.eq.s32.totalorder %v4113_v42, %v4389_v3 }
 0x259   : > { %3136 = vmatpush1.msk.msra.mxu1 %vm1756_vm0, %v5499_v4 }
 0x25a   : > { %3137 = vmatprep.subr.msk.mxu1 %vm1755_vm6, %v5499_v4 }
 0x25b   : > { %3138 = vmatpush1.msk.msra.mxu1 %vm5576_vm11, %v5499_v4 }
 0x25c   : > { %3139 = vmatprep.subr.msk.mxu1 %vm5577_vm4, %v5499_v4 }
 0x25d   : > { %3140 = vmatpush1.msk.msra.mxu1 %vm5578_vm8, %v5499_v4 }
 0x25e   : > { %2729 = vmatmul.mubr.f32.vlgmr.msra.gmra.mxu1 %v4115_v40 }
 0x25f   : > { %3222 = shalt.err (!%p3219_p5)
}
 0x260   : > { %s3223_s18 = scalar_lea.hbm %s2851_s7, 32  ;;  %s3227_s26 = scalar_lea.hbm %s5390_s3, 64 }
 0x261   : > { %p3224_p6 = scmp.ne.s32.totalorder %s2851_s7, %s3223_s18  ;;  %p3228_p10 = scmp.lt.s32.totalorder %s2851_s7, %s5390_s3 }
 0x262   : > { %p3229_p11 = scmp.lt.s32.totalorder %s3227_s26, %s3223_s18 }
 0x263   : > { %p3225_p7 = pnand %p3224_p6, %p3356_p4 }
 0x264   : > { %p3230_p12 = por %p3229_p11, %p3228_p10 }
 0x265   : > { %p3226_p9 = pneg %p3225_p7 }
 0x267   : > { %p3231_p13 = pnand %p3230_p12, %p3226_p9 }
 0x269   : > { %3234 = shalt.err (!%p3231_p13)
}
 0x26a   : > { %3149 = dma.vmem_to_hbm [thread:$0]  (%p3356_p4), %s2854_s8, 32, %s2851_s7, %s2825_s9   ;;  %vm5579_vm0 = vcmp.lt.f32.partialorder %v4162_v32, inf  ;;  %v5580_v29 = vld [vmem:[#allocation12_spill] sm:$0xff] }
 0x26b   : > { %vm5581_vm13 = vcmp.lt.f32.partialorder %v5580_v29, inf  ;;  %s260_s6 = scalar_lea.vmem %s5389_s2, %s3146_s14 }
 0x2d2   : > { %v1983_v42 = vpop.f32.mrf.mxu0 }
 0x2d4   : > { %v1985_v40 = vpop.f32.mrf.mxu0 }
 0x2dc   : > { %v2215_v35 = vpop.f32.mrf.mxu1 }
 0x2dd   : > { %v2216_v41 = vadd.f32 %v2215_v35, %v1983_v42 }
 0x2de   : > { %v2217_v3 = vpop.f32.mrf.mxu1 }
 0x2df   : > { %v2218_v6 = vadd.f32 %v2217_v3, %v1985_v40 }
 0x2f3   : > { %v2352_v36 = vpop.f32.mrf.mxu0 }
 0x2f4   : > { %v2353_v1 = vadd.f32 %v2352_v36, %v2216_v41 }
 0x2f5   : > { %v2354_v30 = vpop.f32.mrf.mxu0 }
 0x2f6   : > { %v2355_v39 = vadd.f32 %v2354_v30, %v2218_v6 }
 0x2fd   : > { %v2458_v61 = vpop.f32.mrf.mxu1 }
 0x2fe   : > { %v2459_v14 = vadd.f32 %v2458_v61, %v2353_v1 }
 0x2ff   : > { %v2460_v17 = vpop.f32.mrf.mxu1 }
 0x300   : > { %v2461_v37 = vadd.f32 %v2460_v17, %v2355_v39 }
 0x315   : > { %v2626_v22 = vpop.f32.mrf.mxu0 }
 0x316   : > { %v2627_v59 = vadd.f32 %v2626_v22, %v2459_v14 }
 0x317   : > { %v2628_v7 = vpop.f32.mrf.mxu0 }
 0x318   : > { %v2629_v23 = vadd.f32 %v2628_v7, %v2461_v37 }
 0x31e   : > { %v2730_v9 = vpop.f32.mrf.mxu1 }
 0x31f   : > { %v2731_v56 = vadd.f32 %v2730_v9, %v2627_v59 }
 0x320   : > { %v2732_v52 = vpop.f32.mrf.mxu1 }
 0x321   : > { %v2745_v4 = vsel %vm5579_vm0, %v2731_v56, 0.0  ;;  %v2733_v53 = vadd.f32 %v2732_v52, %v2629_v23 }
 0x322   : > { %v2747_v2 = vmul.f32 -0.5, %v2745_v4 }
 0x323   : > { %v2746_v43 = vsel %vm5581_vm13, %v2733_v53, 0.0 }
 0x324   : > { %v2748_v0 = vmul.f32 -0.5, %v2746_v43 }
 0x326   : > { %v2751_v24 = vcombine.low %v2747_v2, %v2748_v0 }
 0x328   : > { %2753 = vst [vmem:[%s260_s6] sm:$0xff] %v2751_v24 }
 0x329 PF: > { %p3155_p4 = scmp.ge.s32.totalorder %s3285_s20, 2  ;;  %s2881_s7 = sand.u32 1, %s3265_s15  }
 0x32a   : > { %s2882_s8 = scalar_lea.sflag [#allocation3], %s2881_s7 }
 0x32b   : > { %p3152_p0 = pnand %p3155_p4, %p3363_p8 }
 0x32d   : > { %p3153_p1 = pneg %p3152_p0 }
 0x32f   : > { %3260 = dma.done.wait (%p3153_p1), %s2882_s8, 32  }
 0x330   : > { %3262 = vsyncadd (%p3153_p1), %s2882_s8, 4294967264  ;;  %s18_s20 = sadd.s32 1, %s3285_s20   ;;  %s5582_s15 = smov %s3269_s16 }
 0x331   : > { %p15_p2 = scmp.ge.s32.totalorder %s18_s20, 4   ;;  %s5583_s16 = smov %s3273_s17 }
 0x332   : > { %s5584_s17 = smov %s3369_s28  ;;  %s5585_s18 = smov %s3281_s19 }
 0x333   : > { %s5586_s19 = smov %s5588_s23  ;;  %17 = sbr.rel (!%p15_p2) target bundleno = 4 (0x4), region = 87 }
 0x338   :  { %2898 = vsyncpa [#allocation3], 1 }
 0x339   :  { %2900 = vsyncpa [#allocation3 + $0x1], 1 }

</bundles_post_ra>
